<compile_context>
chip_gen: v6e
topology: v6e:2x2x1
jax: 0.10.0
libtpu: 0.0.40
codegen_flags: <defaults>
</compile_context>

<pallas_src>
import math
from functools import partial

import jax
import jax.numpy as jnp
from jax import lax
from jax.experimental import pallas as pl
from jax.experimental.pallas import tpu as pltpu


_NEG_BIG = -1e30  # finite "minus infinity": no NaN even if a row were fully masked


def _flash_causal_kernel(xq_ref, xkv_ref, w_ref, out_ref,
                         q_sc, m_sc, l_sc, acc_sc, *, tq, tk, dp):
    # xq_ref: (tq, d_in)  xkv_ref: (tk, d_in)  w_ref: (d_in, 3*dp)
    # out_ref: (tq, dp)   scratch: q (tq,dp), m/l (tq,1), acc (tq,dp)
    qi = pl.program_id(1)
    ki = pl.program_id(2)
    nk = pl.num_programs(2)

    @pl.when(ki == 0)
    def _init():
        # Q projection for this query tile; 1/sqrt(d_k) is already folded
        # into the Q columns of the fused weight at trace time.
        q_sc[...] = jnp.dot(xq_ref[...], w_ref[:, :dp],
                            preferred_element_type=jnp.float32)
        m_sc[...] = jnp.full(m_sc.shape, _NEG_BIG, dtype=jnp.float32)
        l_sc[...] = jnp.zeros(l_sc.shape, dtype=jnp.float32)
        acc_sc[...] = jnp.zeros(acc_sc.shape, dtype=jnp.float32)

    # Skip kv blocks that lie entirely above the causal diagonal.
    needed = ki * tk <= qi * tq + (tq - 1)

    @pl.when(needed)
    def _step():
        # Fused K|V projection for this kv tile: one wide matmul, slice after.
        kv = jnp.dot(xkv_ref[...], w_ref[:, dp:],
                     preferred_element_type=jnp.float32)          # (tk, 2*dp)
        k = kv[:, :dp]
        v = kv[:, dp:]

        # scores = Q @ K^T without materializing a transposed copy of K.
        s = lax.dot_general(q_sc[...], k,
                            dimension_numbers=(((1,), (1,)), ((), ())),
                            preferred_element_type=jnp.float32)   # (tq, tk)

        # Causal mask only matters on blocks straddling the diagonal.
        straddles = ki * tk + (tk - 1) > qi * tq
        row = qi * tq + lax.broadcasted_iota(jnp.int32, (tq, tk), 0)
        col = ki * tk + lax.broadcasted_iota(jnp.int32, (tq, tk), 1)
        s = jnp.where(jnp.logical_and(straddles, col > row), _NEG_BIG, s)

        # Online softmax update.
        m_prev = m_sc[...]
        m_new = jnp.maximum(m_prev, jnp.max(s, axis=-1, keepdims=True))
        alpha = jnp.exp(m_prev - m_new)
        p = jnp.exp(s - m_new)
        l_sc[...] = alpha * l_sc[...] + jnp.sum(p, axis=-1, keepdims=True)
        acc_sc[...] = alpha * acc_sc[...] + jnp.dot(
            p.astype(v.dtype), v, preferred_element_type=jnp.float32)
        m_sc[...] = m_new

    @pl.when(ki == nk - 1)
    def _finalize():
        inv_l = pl.reciprocal(l_sc[...], approx=True)   # EUP slot, nearly free
        out_ref[...] = (acc_sc[...] * inv_l).astype(out_ref.dtype)


def causal_attention(x, w_query, w_key, w_value, *, tile=128):
    """Forward of CasualAttention (dropout is identity for p=0.0 / eval).

    x: (B, T, d_in); w_*: (d_out, d_in) as in nn.Linear.weight (bias=False).
    """
    b, t, d_in = x.shape
    d_out = w_query.shape[0]
    dtype = x.dtype

    inv_scale = 1.0 / math.sqrt(d_out)           # true d_k, not the padded one
    dp = ((d_out + 127) // 128) * 128            # lane-dense padded head dim

    def to_cols(w):                              # (d_out, d_in) -> (d_in, dp)
        return jnp.pad(w.T, ((0, 0), (0, dp - d_out)))

    # Fused, padded (d_in, 3*dp) weight: [ Q * inv_scale | K | V ].
    w_qkv = jnp.concatenate(
        [to_cols(w_query) * inv_scale, to_cols(w_key), to_cols(w_value)],
        axis=1).astype(dtype)

    # Pad the sequence to a multiple of the tile size. The causal mask keeps
    # padded keys away from real query rows; padded query rows are sliced off.
    tp = ((t + tile - 1) // tile) * tile
    x_p = jnp.pad(x, ((0, 0), (0, tp - t), (0, 0)))
    nq = tp // tile
    nk = tp // tile

    kernel = partial(_flash_causal_kernel, tq=tile, tk=tile, dp=dp)

    out_p = pl.pallas_call(
        kernel,
        out_shape=jax.ShapeDtypeStruct((b, tp, dp), dtype),
        grid_spec=pltpu.PrefetchScalarGridSpec(
            num_scalar_prefetch=0,
            grid=(b, nq, nk),
            in_specs=[
                pl.BlockSpec((pl.Squeezed(), tile, d_in),
                             lambda bi, qi, ki: (bi, qi, 0)),   # query tile of x
                pl.BlockSpec((pl.Squeezed(), tile, d_in),
                             lambda bi, qi, ki: (bi, ki, 0)),   # kv tile of x
                pl.BlockSpec((d_in, 3 * dp),
                             lambda bi, qi, ki: (0, 0)),        # fused weights
            ],
            out_specs=pl.BlockSpec((pl.Squeezed(), tile, dp),
                                   lambda bi, qi, ki: (bi, qi, 0)),
            scratch_shapes=[
                pltpu.VMEM((tile, dp), jnp.float32),   # cached Q
                pltpu.VMEM((tile, 1), jnp.float32),    # running max m
                pltpu.VMEM((tile, 1), jnp.float32),    # running denom l
                pltpu.VMEM((tile, dp), jnp.float32),   # output accumulator
            ],
        ),
        compiler_params=pltpu.CompilerParams(
            dimension_semantics=("parallel", "parallel", "arbitrary"),
            vmem_limit_bytes=32 * 1024 * 1024,
        ),
    )(x_p, x_p, w_qkv)

    # TODO(synk): nn.Dropout on the attention weights is not reproduced here
    # (identity for dropout=0.0 / eval mode).
    return out_p[:, :t, :d_out]


def _reference(x, w_query, w_key, w_value):
    q = x @ w_query.T
    k = x @ w_key.T
    v = x @ w_value.T
    scores = jnp.einsum("btd,bsd->bts", q, k)
    t = x.shape[1]
    mask = jnp.triu(jnp.ones((t, t), dtype=bool), k=1)
    scores = jnp.where(mask[None], -jnp.inf, scores)
    attn = jax.nn.softmax(scores / math.sqrt(k.shape[-1]), axis=-1)
    return attn @ v


if __name__ == "__main__":
    # Same data as the PyTorch script: batch of 2 copies of the 6x3 inputs.
    inputs = jnp.array(
        [[0.43, 0.15, 0.89],
         [0.55, 0.87, 0.66],
         [0.57, 0.85, 0.64],
         [0.22, 0.58, 0.33],
         [0.77, 0.25, 0.10],
         [0.05, 0.80, 0.55]], dtype=jnp.float32)
    x = jnp.stack((inputs, inputs), axis=0)          # (2, 6, 3)

    d_in = inputs.shape[1]                            # 3
    d_out = 2

    # Deterministic parameter init (nn.Linear weight shape: (d_out, d_in)).
    key = jax.random.PRNGKey(0)
    kq, kk, kv = jax.random.split(key, 3)
    bound = 1.0 / math.sqrt(d_in)
    w_query = jax.random.uniform(kq, (d_out, d_in), jnp.float32, -bound, bound)
    w_key = jax.random.uniform(kk, (d_out, d_in), jnp.float32, -bound, bound)
    w_value = jax.random.uniform(kv, (d_out, d_in), jnp.float32, -bound, bound)

    out = causal_attention(x, w_query, w_key, w_value)
    out = jax.block_until_ready(out)

    ref = _reference(x, w_query, w_key, w_value)
    assert out.shape == (2, 6, d_out)
    # Slightly loose tolerance: finalize uses the approximate EUP reciprocal.
    assert jnp.allclose(out, ref, atol=1e-2, rtol=1e-2), (
        f"max abs err {jnp.max(jnp.abs(out - ref))}")

    print("KERNEL_OK")
</pallas_src>

<mosaic_0001>
module attributes {stable_mosaic.version = 11 : i64} {
  func.func @_flash_causal_kernel(%arg0: i32, %arg1: i32, %arg2: i32, %arg3: memref<1x128x3xf32, #tpu.memory_space<vmem>>, %arg4: memref<1x128x3xf32, #tpu.memory_space<vmem>>, %arg5: memref<3x384xf32, #tpu.memory_space<vmem>>, %arg6: memref<1x128x128xf32, #tpu.memory_space<vmem>>, %arg7: memref<128x128xf32, #tpu.memory_space<vmem>>, %arg8: memref<128x1xf32, #tpu.memory_space<vmem>>, %arg9: memref<128x1xf32, #tpu.memory_space<vmem>>, %arg10: memref<128x128xf32, #tpu.memory_space<vmem>>) attributes {dimension_semantics = [#tpu.dimension_semantics<parallel>, #tpu.dimension_semantics<parallel>, #tpu.dimension_semantics<arbitrary>], iteration_bounds = array<i64: 2, 1, 1>, scalar_prefetch = 0 : i64, scratch_operands = 4 : i64, tpu.core_type = #tpu.core_type<tc>, window_params = [{transform_indices = @transform_0, window_bounds = array<i64: 1, 128, 3>}, {transform_indices = @transform_1, window_bounds = array<i64: 1, 128, 3>}, {pipeline_mode = #tpu.pipeline_mode<synchronous>, transform_indices = @transform_2, window_bounds = array<i64: 3, 384>}, {transform_indices = @transform_3, window_bounds = array<i64: 1, 128, 128>}]} {
    %c0_i32 = arith.constant 0 : i32
    %0 = arith.cmpi eq, %arg2, %c0_i32 : i32
    %1 = arith.extui %0 : i1 to i32
    %c0_i32_0 = arith.constant 0 : i32
    %2 = arith.cmpi ne, %1, %c0_i32_0 : i32
    scf.if %2 {
      %c0 = arith.constant 0 : index
      %c0_5 = arith.constant 0 : index
      %c0_6 = arith.constant 0 : index
      %12 = vector.load %arg3[%c0, %c0_5, %c0_6] : memref<1x128x3xf32, #tpu.memory_space<vmem>>, vector<1x128x3xf32>
      %13 = vector.shape_cast %12 : vector<1x128x3xf32> to vector<128x3xf32>
      %c0_7 = arith.constant 0 : index
      %c0_8 = arith.constant 0 : index
      %14 = vector.load %arg5[%c0_7, %c0_8] : memref<3x384xf32, #tpu.memory_space<vmem>>, vector<3x128xf32>
      %cst = arith.constant dense<0.000000e+00> : vector<128x128xf32>
      %15 = tpu.matmul %13, %14, %cst {dimension_numbers = #tpu.dot_dimension_numbers<[1], [0], [0], [1], [0, 0, 1, 1], [], []>} : vector<128x3xf32>, vector<3x128xf32>, vector<128x128xf32> -> vector<128x128xf32>
      %c0_9 = arith.constant 0 : index
      %c0_10 = arith.constant 0 : index
      %16 = vector.load %arg7[%c0_9, %c0_10] : memref<128x128xf32, #tpu.memory_space<vmem>>, vector<128x128xf32>
      tpu.vector_store %arg7[%c0_9, %c0_10], %15 {strides = array<i32>} : memref<128x128xf32, #tpu.memory_space<vmem>>, vector<128x128xf32>,
      %cst_11 = arith.constant -1.000000e+30 : f32
      %17 = vector.broadcast %cst_11 : f32 to vector<128x1xf32>
      %c0_12 = arith.constant 0 : index
      %c0_13 = arith.constant 0 : index
      %18 = vector.load %arg8[%c0_12, %c0_13] : memref<128x1xf32, #tpu.memory_space<vmem>>, vector<128x1xf32>
      tpu.vector_store %arg8[%c0_12, %c0_13], %17 {strides = array<i32>} : memref<128x1xf32, #tpu.memory_space<vmem>>, vector<128x1xf32>,
      %cst_14 = arith.constant 0.000000e+00 : f32
      %19 = vector.broadcast %cst_14 : f32 to vector<128x1xf32>
      %c0_15 = arith.constant 0 : index
      %c0_16 = arith.constant 0 : index
      %20 = vector.load %arg9[%c0_15, %c0_16] : memref<128x1xf32, #tpu.memory_space<vmem>>, vector<128x1xf32>
      tpu.vector_store %arg9[%c0_15, %c0_16], %19 {strides = array<i32>} : memref<128x1xf32, #tpu.memory_space<vmem>>, vector<128x1xf32>,
      %cst_17 = arith.constant 0.000000e+00 : f32
      %21 = vector.broadcast %cst_17 : f32 to vector<128x128xf32>
      %c0_18 = arith.constant 0 : index
      %c0_19 = arith.constant 0 : index
      %22 = vector.load %arg10[%c0_18, %c0_19] : memref<128x128xf32, #tpu.memory_space<vmem>>, vector<128x128xf32>
      tpu.vector_store %arg10[%c0_18, %c0_19], %21 {strides = array<i32>} : memref<128x128xf32, #tpu.memory_space<vmem>>, vector<128x128xf32>,
    } else {
    }
    %c128_i32 = arith.constant 128 : i32
    %3 = arith.muli %arg2, %c128_i32 : i32
    %c128_i32_1 = arith.constant 128 : i32
    %4 = arith.muli %arg1, %c128_i32_1 : i32
    %c127_i32 = arith.constant 127 : i32
    %5 = arith.addi %4, %c127_i32 : i32
    %6 = arith.cmpi sle, %3, %5 : i32
    %7 = arith.extui %6 : i1 to i32
    %c0_i32_2 = arith.constant 0 : i32
    %8 = arith.cmpi ne, %7, %c0_i32_2 : i32
    scf.if %8 {
      %c0 = arith.constant 0 : index
      %c0_5 = arith.constant 0 : index
      %c0_6 = arith.constant 0 : index
      %12 = vector.load %arg4[%c0, %c0_5, %c0_6] : memref<1x128x3xf32, #tpu.memory_space<vmem>>, vector<1x128x3xf32>
      %13 = vector.shape_cast %12 : vector<1x128x3xf32> to vector<128x3xf32>
      %c0_7 = arith.constant 0 : index
      %c128 = arith.constant 128 : index
      %14 = vector.load %arg5[%c0_7, %c128] : memref<3x384xf32, #tpu.memory_space<vmem>>, vector<3x256xf32>
      %cst = arith.constant dense<0.000000e+00> : vector<128x256xf32>
      %15 = tpu.matmul %13, %14, %cst {dimension_numbers = #tpu.dot_dimension_numbers<[1], [0], [0], [1], [0, 0, 1, 1], [], []>} : vector<128x3xf32>, vector<3x256xf32>, vector<128x256xf32> -> vector<128x256xf32>
      %16 = vector.extract_strided_slice %15 {offsets = [0, 0], sizes = [128, 128], strides = [1, 1]} : vector<128x256xf32> to vector<128x128xf32>
      %17 = vector.extract_strided_slice %15 {offsets = [0, 128], sizes = [128, 128], strides = [1, 1]} : vector<128x256xf32> to vector<128x128xf32>
      %c0_8 = arith.constant 0 : index
      %c0_9 = arith.constant 0 : index
      %18 = vector.load %arg7[%c0_8, %c0_9] : memref<128x128xf32, #tpu.memory_space<vmem>>, vector<128x128xf32>
      %cst_10 = arith.constant dense<0.000000e+00> : vector<128x128xf32>
      %19 = tpu.matmul %18, %16, %cst_10 {dimension_numbers = #tpu.dot_dimension_numbers<[1], [1], [0], [0], [0, 0, 1, 0], [], []>} : vector<128x128xf32>, vector<128x128xf32>, vector<128x128xf32> -> vector<128x128xf32>
      %c128_i32_11 = arith.constant 128 : i32
      %20 = arith.muli %arg2, %c128_i32_11 : i32
      %c127_i32_12 = arith.constant 127 : i32
      %21 = arith.addi %20, %c127_i32_12 : i32
      %c128_i32_13 = arith.constant 128 : i32
      %22 = arith.muli %arg1, %c128_i32_13 : i32
      %23 = arith.cmpi sgt, %21, %22 : i32
      %c128_i32_14 = arith.constant 128 : i32
      %24 = arith.muli %arg1, %c128_i32_14 : i32
      %25 = tpu.iota {dimensions = array<i32: 0>} : vector<128x128xi32>
      %26 = vector.broadcast %24 : i32 to vector<128x128xi32>
      %27 = arith.addi %26, %25 : vector<128x128xi32>
      %c128_i32_15 = arith.constant 128 : i32
      %28 = arith.muli %arg2, %c128_i32_15 : i32
      %29 = tpu.iota {dimensions = array<i32: 1>} : vector<128x128xi32>
      %30 = vector.broadcast %28 : i32 to vector<128x128xi32>
      %31 = arith.addi %30, %29 : vector<128x128xi32>
      %32 = arith.cmpi sgt, %31, %27 : vector<128x128xi32>
      %33 = vector.broadcast %23 : i1 to vector<128x128xi1>
      %34 = arith.andi %33, %32 : vector<128x128xi1>
      %cst_16 = arith.constant -1.000000e+30 : f32
      %35 = vector.broadcast %cst_16 : f32 to vector<128x128xf32>
      %36 = arith.select %34, %35, %19 : vector<128x128xi1>, vector<128x128xf32>
      %c0_17 = arith.constant 0 : index
      %c0_18 = arith.constant 0 : index
      %37 = vector.load %arg8[%c0_17, %c0_18] : memref<128x1xf32, #tpu.memory_space<vmem>>, vector<128x1xf32>
      %cst_19 = arith.constant dense<0xFF800000> : vector<128xf32>
      %38 = vector.multi_reduction <maximumf>, %36, %cst_19 [1] : vector<128x128xf32> to vector<128xf32>
      %39 = vector.shape_cast %38 : vector<128xf32> to vector<128x1xf32>
      %40 = arith.maximumf %37, %39 : vector<128x1xf32>
      %41 = arith.subf %37, %40 : vector<128x1xf32>
      %42 = math.exp %41 : vector<128x1xf32>
      %43 = vector.broadcast %40 : vector<128x1xf32> to vector<128x128xf32>
      %44 = arith.subf %36, %43 : vector<128x128xf32>
      %45 = math.exp %44 : vector<128x128xf32>
      %c0_20 = arith.constant 0 : index
      %c0_21 = arith.constant 0 : index
      %46 = vector.load %arg9[%c0_20, %c0_21] : memref<128x1xf32, #tpu.memory_space<vmem>>, vector<128x1xf32>
      %47 = arith.mulf %42, %46 : vector<128x1xf32>
      %cst_22 = arith.constant dense<0.000000e+00> : vector<128xf32>
      %48 = vector.multi_reduction <add>, %45, %cst_22 [1] : vector<128x128xf32> to vector<128xf32>
      %49 = vector.shape_cast %48 : vector<128xf32> to vector<128x1xf32>
      %50 = arith.addf %47, %49 : vector<128x1xf32>
      %c0_23 = arith.constant 0 : index
      %c0_24 = arith.constant 0 : index
      %51 = vector.load %arg9[%c0_23, %c0_24] : memref<128x1xf32, #tpu.memory_space<vmem>>, vector<128x1xf32>
      tpu.vector_store %arg9[%c0_23, %c0_24], %50 {strides = array<i32>} : memref<128x1xf32, #tpu.memory_space<vmem>>, vector<128x1xf32>,
      %c0_25 = arith.constant 0 : index
      %c0_26 = arith.constant 0 : index
      %52 = vector.load %arg10[%c0_25, %c0_26] : memref<128x128xf32, #tpu.memory_space<vmem>>, vector<128x128xf32>
      %53 = vector.broadcast %42 : vector<128x1xf32> to vector<128x128xf32>
      %54 = arith.mulf %53, %52 : vector<128x128xf32>
      %cst_27 = arith.constant dense<0.000000e+00> : vector<128x128xf32>
      %55 = tpu.matmul %45, %17, %cst_27 {dimension_numbers = #tpu.dot_dimension_numbers<[1], [0], [0], [1], [0, 0, 1, 1], [], []>} : vector<128x128xf32>, vector<128x128xf32>, vector<128x128xf32> -> vector<128x128xf32>
      %56 = arith.addf %54, %55 : vector<128x128xf32>
      %c0_28 = arith.constant 0 : index
      %c0_29 = arith.constant 0 : index
      %57 = vector.load %arg10[%c0_28, %c0_29] : memref<128x128xf32, #tpu.memory_space<vmem>>, vector<128x128xf32>
      tpu.vector_store %arg10[%c0_28, %c0_29], %56 {strides = array<i32>} : memref<128x128xf32, #tpu.memory_space<vmem>>, vector<128x128xf32>,
      %c0_30 = arith.constant 0 : index
      %c0_31 = arith.constant 0 : index
      %58 = vector.load %arg8[%c0_30, %c0_31] : memref<128x1xf32, #tpu.memory_space<vmem>>, vector<128x1xf32>
      tpu.vector_store %arg8[%c0_30, %c0_31], %40 {strides = array<i32>} : memref<128x1xf32, #tpu.memory_space<vmem>>, vector<128x1xf32>,
    } else {
    }
    %c0_i32_3 = arith.constant 0 : i32
    %9 = arith.cmpi eq, %arg2, %c0_i32_3 : i32
    %10 = arith.extui %9 : i1 to i32
    %c0_i32_4 = arith.constant 0 : i32
    %11 = arith.cmpi ne, %10, %c0_i32_4 : i32
    scf.if %11 {
      %c0 = arith.constant 0 : index
      %c0_5 = arith.constant 0 : index
      %12 = vector.load %arg9[%c0, %c0_5] : memref<128x1xf32, #tpu.memory_space<vmem>>, vector<128x1xf32>
      %13 = tpu.reciprocal %12 {approx = true} : vector<128x1xf32> -> vector<128x1xf32>
      %c0_6 = arith.constant 0 : index
      %c0_7 = arith.constant 0 : index
      %14 = vector.load %arg10[%c0_6, %c0_7] : memref<128x128xf32, #tpu.memory_space<vmem>>, vector<128x128xf32>
      %15 = vector.broadcast %13 : vector<128x1xf32> to vector<128x128xf32>
      %16 = arith.mulf %14, %15 : vector<128x128xf32>
      %c0_8 = arith.constant 0 : index
      %c0_9 = arith.constant 0 : index
      %c0_10 = arith.constant 0 : index
      %17 = vector.load %arg6[%c0_8, %c0_9, %c0_10] : memref<1x128x128xf32, #tpu.memory_space<vmem>>, vector<1x128x128xf32>
      %18 = vector.shape_cast %17 : vector<1x128x128xf32> to vector<128x128xf32>
      %19 = vector.shape_cast %16 : vector<128x128xf32> to vector<1x128x128xf32>
      tpu.vector_store %arg6[%c0_8, %c0_9, %c0_10], %19 {strides = array<i32>} : memref<1x128x128xf32, #tpu.memory_space<vmem>>, vector<1x128x128xf32>,
    } else {
    }
    return
  }
  func.func @transform_0(%arg0: i32, %arg1: i32, %arg2: i32) -> (i32, i32, i32) {
    %c0_i32 = arith.constant 0 : i32
    %c0_i32_0 = arith.constant 0 : i32
    return %arg0, %arg1, %c0_i32 : i32, i32, i32
  }
  func.func @transform_1(%arg0: i32, %arg1: i32, %arg2: i32) -> (i32, i32, i32) {
    %c0_i32 = arith.constant 0 : i32
    %c0_i32_0 = arith.constant 0 : i32
    return %arg0, %arg2, %c0_i32 : i32, i32, i32
  }
  func.func @transform_2(%arg0: i32, %arg1: i32, %arg2: i32) -> (i32, i32) {
    %c0_i32 = arith.constant 0 : i32
    %c0_i32_0 = arith.constant 0 : i32
    %c0_i32_1 = arith.constant 0 : i32
    return %c0_i32, %c0_i32_0 : i32, i32
  }
  func.func @transform_3(%arg0: i32, %arg1: i32, %arg2: i32) -> (i32, i32, i32) {
    %c0_i32 = arith.constant 0 : i32
    %c0_i32_0 = arith.constant 0 : i32
    return %arg0, %arg1, %c0_i32 : i32, i32, i32
  }
}

</mosaic_0001>

<bundles_post_ra>
// kernel: tpu_custom_call.1
= control target key start
LH: loop header
LB: loop body
LE: loop exit
PB: predicated region body
PF: predicated region fallthrough
CT: control target
= control target key end

     0   :  { %8 = vsyncpa [#allocation7], 0  ;;  %s3187_s0 = inlined_call_operand.vmem [shape: f32[2,128,3], index: 0, kind: input, shape index: {}]   ;;  %s3188_s1 = inlined_call_operand.vmem [shape: f32[2,128,3], index: 1, kind: input, shape index: {}]   ;;  %s3189_s2 = inlined_call_operand.vmem [shape: f32[3,384], index: 2, kind: input, shape index: {}]   ;;  %s3190_s3 = inlined_call_operand.hbm [shape: f32[2,128,128], index: 3, kind: output, shape index: {}]  }
   0x1   :  { %10 = vsyncpa [#allocation7 + $0x1], 0  ;;  %s2476_s12 = smov 0   ;;  %s2478_s13 = smov 0  }
   0x2   :  { %s2480_s14 = smov 0   ;;  %s2482_s15 = smov 0  }
   0x3   :  { %s2484_s16 = smov 0   ;;  %s2486_s17 = smov 0  }
   0x4 LB: > { %s1941_s18 = sadd.s32 4294967295, %s2448_s17   ;;  %s1942_s19 = sadd.s32 4294967294, %s2448_s17   ;;  %s2448_s17 = sphi %s2486_s17, %s16_s17   ;;  %s2444_s16 = sphi %s2484_s16, %s3210_s16   ;;  %s2440_s15 = sphi %s2482_s15, %s3209_s15   ;;  %s2436_s14 = sphi %s2480_s14, %s3208_s14   ;;  %s2432_s13 = sphi %s2478_s13, %s3207_s13   ;;  %s2428_s12 = sphi %s2476_s12, %s3206_s12  }
   0x5   : > { %s35_s20 = sadd.s32 1, %s2444_s16  ;;  %s121_s21 = sadd.s32 1, %s2436_s14 }
   0x6   : > { %p37_p0 = scmp.ge.s32.totalorder %s35_s20, 2  ;;  %p131_p1 = scmp.ne.s32.totalorder %s2436_s14, %s2432_s13 }
   0x7   : > { %p132_p2 = scmp.eq.s32.totalorder %s1941_s18, 1  ;;  %p137_p3 = scmp.ne.s32.totalorder %s2432_s13, %s2428_s12 }
   0x8   : > { %s3212_s20 = smov (%p37_p0, %s35_s20), 0  ;;  %p138_p5 = scmp.eq.s32.totalorder %s1942_s19, 1 }
   0x9   : > { %p2516_p4 = por %p132_p2, %p131_p1  ;;  %s116_s23 = ssub.s32 %s2444_s16, %s3212_s20 }
   0xa   : > { %p1945_p6 = scmp.ge.s32.totalorder %s2448_s17, 1  ;;  %p119_p7 = scmp.eq.s32.totalorder %s116_s23, 0 }
   0xb   : > { %p2523_p8 = por %p138_p5, %p137_p3  ;;  %p185_p9 = scmp.lt.s32.totalorder %s2448_s17, 3 }
   0xc   : > { %s2529_s25 = scalar_select %p119_p7, %s2436_s14, %s121_s21  }
   0xd   : > { %p186_p10 = pnand %p1945_p6, %p185_p9 }
   0xe   : > { %p223_p11 = scmp.lt.s32.totalorder (!%p186_p10), %s2440_s15, 1  ;;  %s219_s11 = sand.u32 (!%p186_p10), 1, %s2432_s13  }
   0xf   : > { %189 = sbr.rel (%p186_p10) target bundleno = 1167 (0x48f), region = 32  ;;  %s1946_s18 = sshll.u32 (!%p186_p10), %s219_s11, 7 }
  0x10   : > { %s3107_s19 = scalar_lea.vmem (!%p186_p10), [#allocation6], %s1946_s18  ;;  %s1993_s21 = sshll.u32 (!%p186_p10), %s2440_s15, 11 }
  0x11   : > { %s1841_s23 = sshll.u32 (!%p186_p10), %s3107_s19, 4  ;;  %s3135_s28 = scalar_lea.hbm (!%p186_p10), %s3190_s3, %s1993_s21  ;;  %s3137_s23 = int_to_ptr.vmem [resolvable:$true] %s1841_s23 }
  0x12   : > { %s2372_s29 = scalar_lea.vmem (!%p186_p10), %s3137_s23, 2048 }
  0x13   : > { %p2373_p12 = scmp.ne.s32.totalorder (!%p186_p10), %s3137_s23, %s2372_s29 }
  0x14   : > { %vm313_vm0 = vcmask 1042432   ;;  %v550_v0 = vld [vmem:[%s3189_s2 + $0x4] sm:$0x77]  ;;  %v2450_v2 = vmov 0.0   ;;  %v263_v3 = vld [vmem:[%s3189_s2] sm:$0x7] }
  0x15   : > { %v552_v1 = vcombine.high %v550_v0, %v550_v0  ;;  %671 = vmatprep.mubr.f32.mxu1 %v2450_v2  ;;  %s224_s30 = scalar_select %p223_p11, %s2440_s15, 1  ;;  %2075 = vmatprep.subr.msk.mxu0 %vm313_vm0, %v263_v3  ;;  %vm264_vm1 = vcmask 23552   ;;  %vm478_vm2 = vcmask 7168  }
  0x16   : > { %2076 = vmatpush3.msk.msra.mxu0 %vm313_vm0, %v263_v3  ;;  %495 = vst.msk [vmem:[#allocation4] sm:$0xff] %vm478_vm2, %v2450_v2  ;;  %496 = vst.msk [vmem:[#allocation4 + $0x8] sm:$0xff] %vm478_vm2, %v2450_v2  ;;  %s3142_s15 = scalar_lea.sflag [#allocation7], %s219_s11  ;;  %p2374_p13 = pnand %p2373_p12, %p2516_p4 }
  0x17   : > { %1968 = vmatprep.subr.msk.mxu1 %vm313_vm0, %v552_v1  ;;  %s1991_s4 = sshll.u32 %s224_s30, 7  ;;  %497 = vst.msk [vmem:[#allocation4 + $0x10] sm:$0xff] %vm478_vm2, %v2450_v2  ;;  %498 = vst.msk [vmem:[#allocation4 + $0x18] sm:$0xff] %vm478_vm2, %v2450_v2  ;;  %s2453_s30 = smov [#allocation6]  }
  0x18   : > { %1969 = vmatpush1.msk.msra.mxu1 %vm313_vm0, %v550_v0  ;;  %s2543_s7 = scalar_lea.vmem %s3188_s1, %s1991_s4  ;;  %s2552_s10 = scalar_lea.vmem %s3187_s0, %s1991_s4  ;;  %499 = vst.msk [vmem:[#allocation4 + $0x20] sm:$0xff] %vm478_vm2, %v2450_v2  ;;  %500 = vst.msk [vmem:[#allocation4 + $0x28] sm:$0xff] %vm478_vm2, %v2450_v2 }
  0x19   : > { %v534_v4 = vld [vmem:[%s2543_s7] sm:$0xff]  ;;  %v535_v5 = vld [vmem:[%s2543_s7 + $0x8] sm:$0xff]  ;;  %v536_v8 = vld [vmem:[%s2543_s7 + $0x10] sm:$0xff]  ;;  %501 = vst.msk [vmem:[#allocation4 + $0x30] sm:$0xff] %vm478_vm2, %v2450_v2  ;;  %p2375_p0 = pneg %p2374_p13  ;;  %s2376_s4 = sshll.u32 %s2453_s30, 4  ;;  %s2377_s4 = int_to_ptr.vmem [resolvable:$false] %s2376_s4 }
  0x1a   : > { %1970 = vmatmul.mubr.msk.f32.vlgmr.msra.gmra.mxu1 %vm264_vm1, %v534_v4  ;;  %v247_v6 = vld [vmem:[%s2552_s10] sm:$0xff]  ;;  %v248_v7 = vld [vmem:[%s2552_s10 + $0x8] sm:$0xff]  ;;  %v249_v9 = vld [vmem:[%s2552_s10 + $0x10] sm:$0xff]  ;;  %502 = vst.msk [vmem:[#allocation4 + $0x38] sm:$0xff] %vm478_vm2, %v2450_v2  ;;  %s2378_s5 = scalar_lea.vmem %s2377_s4, 4096  ;;  %p2379_p1 = scmp.lt.s32.totalorder %s3137_s23, %s2377_s4 }
  0x1b   : > { %677 = vmatprep.mubr.f32.mxu1 %v2450_v2  ;;  %2077 = vmatprep.mubr.msk.f32.mxu0 %vm264_vm1, %v247_v6  ;;  %v250_v10 = vld [vmem:[%s2552_s10 + $0x18] sm:$0xff]  ;;  %v251_v11 = vld [vmem:[%s2552_s10 + $0x20] sm:$0xff]  ;;  %v252_v13 = vld [vmem:[%s2552_s10 + $0x28] sm:$0xff]  ;;  %503 = vst.msk [vmem:[#allocation4 + $0x40] sm:$0xff] %vm478_vm2, %v2450_v2  ;;  %p2380_p2 = scmp.lt.s32.totalorder %s2378_s5, %s2372_s29 }
  0x1c   : > { %2078 = vmatmul.mubr.msk.f32.vlgmr.msra.gmra.mxu0 %vm264_vm1, %v248_v7  ;;  %v537_v12 = vld [vmem:[%s2543_s7 + $0x18] sm:$0xff]  ;;  %v253_v14 = vld [vmem:[%s2552_s10 + $0x30] sm:$0xff]  ;;  %v538_v15 = vld [vmem:[%s2543_s7 + $0x20] sm:$0xff]  ;;  %504 = vst.msk [vmem:[#allocation4 + $0x48] sm:$0xff] %vm478_vm2, %v2450_v2 }
  0x1d   : > { %2080 = vmatprep.mubr.msk.f32.mxu0 %vm264_vm1, %v249_v9  ;;  %v254_v16 = vld [vmem:[%s2552_s10 + $0x38] sm:$0xff]  ;;  %v255_v17 = vld [vmem:[%s2552_s10 + $0x40] sm:$0xff]  ;;  %v539_v18 = vld [vmem:[%s2543_s7 + $0x28] sm:$0xff]  ;;  %505 = vst.msk [vmem:[#allocation4 + $0x50] sm:$0xff] %vm478_vm2, %v2450_v2  ;;  %p2381_p3 = por %p2380_p2, %p2379_p1 }
  0x1e   : > { %1971 = vmatmul.mubr.msk.f32.gmra.mxu1 %vm264_vm1, %v535_v5  ;;  %v256_v19 = vld [vmem:[%s2552_s10 + $0x48] sm:$0xff]  ;;  %v257_v20 = vld [vmem:[%s2552_s10 + $0x50] sm:$0xff]  ;;  %v258_v22 = vld [vmem:[%s2552_s10 + $0x58] sm:$0xff]  ;;  %506 = vst.msk [vmem:[#allocation4 + $0x58] sm:$0xff] %vm478_vm2, %v2450_v2 }
  0x1f   : > { %683 = vmatprep.mubr.f32.mxu1 %v2450_v2  ;;  %v540_v21 = vld [vmem:[%s2543_s7 + $0x30] sm:$0xff]  ;;  %v259_v23 = vld [vmem:[%s2552_s10 + $0x60] sm:$0xff]  ;;  %v541_v24 = vld [vmem:[%s2543_s7 + $0x38] sm:$0xff]  ;;  %507 = vst.msk [vmem:[#allocation4 + $0x60] sm:$0xff] %vm478_vm2, %v2450_v2  ;;  %p2382_p5 = pnand %p2381_p3, %p2375_p0 }
  0x20   : > { %2081 = vmatmul.mubr.msk.f32.gmra.mxu0 %vm264_vm1, %v250_v10  ;;  %v260_v25 = vld [vmem:[%s2552_s10 + $0x68] sm:$0xff]  ;;  %v261_v26 = vld [vmem:[%s2552_s10 + $0x70] sm:$0xff]  ;;  %v542_v27 = vld [vmem:[%s2543_s7 + $0x40] sm:$0xff]  ;;  %508 = vst.msk [vmem:[#allocation4 + $0x68] sm:$0xff] %vm478_vm2, %v2450_v2 }
  0x21   : > { %2083 = vmatprep.mubr.msk.f32.mxu0 %vm264_vm1, %v251_v11  ;;  %v262_v28 = vld [vmem:[%s2552_s10 + $0x78] sm:$0xff]  ;;  %v543_v29 = vld [vmem:[%s2543_s7 + $0x48] sm:$0xff]  ;;  %v544_v30 = vld [vmem:[%s2543_s7 + $0x50] sm:$0xff]  ;;  %509 = vst.msk [vmem:[#allocation4 + $0x70] sm:$0xff] %vm478_vm2, %v2450_v2 }
  0x22   : > { %1972 = vmatmul.mubr.msk.f32.gmra.mxu1 %vm264_vm1, %v536_v8  ;;  %v545_v31 = vld [vmem:[%s2543_s7 + $0x58] sm:$0xff]  ;;  %v546_v32 = vld [vmem:[%s2543_s7 + $0x60] sm:$0xff]  ;;  %v547_v33 = vld [vmem:[%s2543_s7 + $0x68] sm:$0xff]  ;;  %510 = vst.msk [vmem:[#allocation4 + $0x78] sm:$0xff] %vm478_vm2, %v2450_v2 }
  0x23   : > { %689 = vmatprep.mubr.f32.mxu1 %v2450_v2  ;;  %v548_v34 = vld [vmem:[%s2543_s7 + $0x70] sm:$0xff]  ;;  %v549_v35 = vld [vmem:[%s2543_s7 + $0x78] sm:$0xff] }
  0x24   : > { %2084 = vmatmul.mubr.msk.f32.gmra.mxu0 %vm264_vm1, %v252_v13 }
  0x25   : > { %2086 = vmatprep.mubr.msk.f32.mxu0 %vm264_vm1, %v253_v14 }
  0x26   : > { %1973 = vmatmul.mubr.msk.f32.gmra.mxu1 %vm264_vm1, %v537_v12 }
  0x27   : > { %695 = vmatprep.mubr.f32.mxu1 %v2450_v2 }
  0x28   : > { %2087 = vmatmul.mubr.msk.f32.gmra.mxu0 %vm264_vm1, %v254_v16 }
  0x29   : > { %2089 = vmatprep.mubr.msk.f32.mxu0 %vm264_vm1, %v255_v17 }
  0x2a   : > { %1974 = vmatmul.mubr.msk.f32.gmra.mxu1 %vm264_vm1, %v538_v15 }
  0x2b   : > { %701 = vmatprep.mubr.f32.mxu1 %v2450_v2 }
  0x2c   : > { %2090 = vmatmul.mubr.msk.f32.gmra.mxu0 %vm264_vm1, %v256_v19 }
  0x2d   : > { %2092 = vmatprep.mubr.msk.f32.mxu0 %vm264_vm1, %v257_v20 }
  0x2e   : > { %1975 = vmatmul.mubr.msk.f32.gmra.mxu1 %vm264_vm1, %v539_v18 }
  0x2f   : > { %707 = vmatprep.mubr.f32.mxu1 %v2450_v2 }
  0x30   : > { %2093 = vmatmul.mubr.msk.f32.gmra.mxu0 %vm264_vm1, %v258_v22  ;;  %v931_v22 = vlaneseq }
  0x31   : > { %2095 = vmatprep.mubr.msk.f32.mxu0 %vm264_vm1, %v259_v23 }
  0x32   : > { %1976 = vmatmul.mubr.msk.f32.gmra.mxu1 %vm264_vm1, %v540_v21  ;;  %v2451_v21 = vmov -1e+30   ;;  %v2728_v23 = vshrl.u32 %v931_v22, 7 }
  0x33   : > { %713 = vmatprep.mubr.f32.mxu1 %v2450_v2  ;;  %479 = vst.msk [vmem:[#allocation3] sm:$0xff] %vm478_vm2, %v2451_v21  ;;  %480 = vst.msk [vmem:[#allocation3 + $0x8] sm:$0xff] %vm478_vm2, %v2451_v21 }
  0x34   : > { %2096 = vmatmul.mubr.msk.f32.gmra.mxu0 %vm264_vm1, %v260_v25  ;;  %481 = vst.msk [vmem:[#allocation3 + $0x10] sm:$0xff] %vm478_vm2, %v2451_v21  ;;  %482 = vst.msk [vmem:[#allocation3 + $0x18] sm:$0xff] %vm478_vm2, %v2451_v21  ;;  %v935_v25 = vadd.s32 24, %v2728_v23 }
  0x35   : > { %2098 = vmatprep.mubr.msk.f32.mxu0 %vm264_vm1, %v261_v26  ;;  %483 = vst.msk [vmem:[#allocation3 + $0x20] sm:$0xff] %vm478_vm2, %v2451_v21  ;;  %484 = vst.msk [vmem:[#allocation3 + $0x28] sm:$0xff] %vm478_vm2, %v2451_v21 }
  0x36   : > { %1977 = vmatmul.mubr.msk.f32.gmra.mxu1 %vm264_vm1, %v541_v24  ;;  %485 = vst.msk [vmem:[#allocation3 + $0x30] sm:$0xff] %vm478_vm2, %v2451_v21  ;;  %486 = vst.msk [vmem:[#allocation3 + $0x38] sm:$0xff] %vm478_vm2, %v2451_v21  ;;  %v2730_v24 = vand.u32 127, %v931_v22 }
  0x37   : > { %719 = vmatprep.mubr.f32.mxu1 %v2450_v2  ;;  %487 = vst.msk [vmem:[#allocation3 + $0x40] sm:$0xff] %vm478_vm2, %v2451_v21  ;;  %488 = vst.msk [vmem:[#allocation3 + $0x48] sm:$0xff] %vm478_vm2, %v2451_v21 }
  0x38   : > { %2099 = vmatmul.mubr.msk.f32.gmra.mxu0 %vm264_vm1, %v262_v28  ;;  %489 = vst.msk [vmem:[#allocation3 + $0x50] sm:$0xff] %vm478_vm2, %v2451_v21  ;;  %490 = vst.msk [vmem:[#allocation3 + $0x58] sm:$0xff] %vm478_vm2, %v2451_v21  ;;  %vm969_vm3 = vcmp.gt.s32.totalorder %v2730_v24, %v2728_v23  ;;  %v934_v28 = vadd.s32 16, %v2728_v23  ;;  %vm972_vm4 = vcmp.gt.s32.totalorder %v2730_v24, %v935_v25 }
  0x39   : > { %491 = vst.msk [vmem:[#allocation3 + $0x60] sm:$0xff] %vm478_vm2, %v2451_v21  ;;  %492 = vst.msk [vmem:[#allocation3 + $0x68] sm:$0xff] %vm478_vm2, %v2451_v21 }
  0x3a   : > { %1978 = vmatmul.mubr.msk.f32.gmra.mxu1 %vm264_vm1, %v542_v27  ;;  %493 = vst.msk [vmem:[#allocation3 + $0x70] sm:$0xff] %vm478_vm2, %v2451_v21  ;;  %494 = vst.msk [vmem:[#allocation3 + $0x78] sm:$0xff] %vm478_vm2, %v2451_v21  ;;  %v933_v27 = vadd.s32 8, %v2728_v23  ;;  %vm971_vm6 = vcmp.gt.s32.totalorder %v2730_v24, %v934_v28 }
  0x3b   : > { %725 = vmatprep.mubr.f32.mxu1 %v2450_v2 }
  0x3c   : > { %vm970_vm5 = vcmp.gt.s32.totalorder %v2730_v24, %v933_v27  ;;  %v2838_v22 = vld [vmem:[#allocation3 + $0x20] sm:$0xff]  ;;  %v2848_v25 = vld [vmem:[#allocation3 + $0x28] sm:$0xff] }
  0x3e   : > { %1979 = vmatmul.mubr.msk.f32.gmra.mxu1 %vm264_vm1, %v543_v29 }
  0x3f   : > { %731 = vmatprep.mubr.f32.mxu1 %v2450_v2 }
  0x42   : > { %1980 = vmatmul.mubr.msk.f32.gmra.mxu1 %vm264_vm1, %v544_v30 }
  0x43   : > { %737 = vmatprep.mubr.f32.mxu1 %v2450_v2 }
  0x46   : > { %1981 = vmatmul.mubr.msk.f32.gmra.mxu1 %vm264_vm1, %v545_v31  ;;  %v937_v31 = vadd.s32 40, %v2728_v23 }
  0x47   : > { %743 = vmatprep.mubr.f32.mxu1 %v2450_v2 }
  0x48   : > { %vm974_vm7 = vcmp.gt.s32.totalorder %v2730_v24, %v937_v31 }
  0x4a   : > { %1982 = vmatmul.mubr.msk.f32.gmra.mxu1 %vm264_vm1, %v546_v32  ;;  %v936_v32 = vadd.s32 32, %v2728_v23 }
  0x4b   : > { %749 = vmatprep.mubr.f32.mxu1 %v2450_v2 }
  0x4c   : > { %vm973_vm8 = vcmp.gt.s32.totalorder %v2730_v24, %v936_v32 }
  0x4e   : > { %1983 = vmatmul.mubr.msk.f32.gmra.mxu1 %vm264_vm1, %v547_v33 }
  0x4f   : > { %755 = vmatprep.mubr.f32.mxu1 %v2450_v2 }
  0x52   : > { %1984 = vmatmul.mubr.msk.f32.gmra.mxu1 %vm264_vm1, %v548_v34 }
  0x53   : > { %761 = vmatprep.mubr.f32.mxu1 %v2450_v2 }
  0x56   : > { %1985 = vmatmul.mubr.msk.f32.gmra.mxu1 %vm264_vm1, %v549_v35 }
  0xda   : > { %v2629_v36 = vpop.f32.mrf.mxu1 }
  0xdc   : > { %v2631_v37 = vpop.f32.mrf.mxu1  ;;  %v2637_v40 = vpop.f32.mrf.mxu0 }
  0xde   : > { %v2633_v38 = vpop.f32.mrf.mxu1  ;;  %v383_v42 = vpop.f32.mrf.mxu0 }
  0xdf   : > { %2133 = vmatprep.mubr.f32.mxu0 %v383_v42 }
  0xe0   : > { %v2635_v39 = vpop.f32.mrf.mxu1  ;;  %v2082_v7 = vpop.f32.mrf.mxu0 }
  0xe2   : > { %v2639_v41 = vpop.f32.mrf.mxu1  ;;  %v393_v8 = vpop.f32.mrf.mxu0 }
  0xe4   : > { %v2641_v43 = vpop.f32.mrf.mxu1  ;;  %v2085_v9 = vpop.f32.mrf.mxu0 }
  0xe6   : > { %v2643_v44 = vpop.f32.mrf.mxu1  ;;  %v403_v10 = vpop.f32.mrf.mxu0 }
  0xe8   : > { %v2645_v45 = vpop.f32.mrf.mxu1  ;;  %v2088_v11 = vpop.f32.mrf.mxu0 }
  0xea   : > { %v2647_v46 = vpop.f32.mrf.mxu1  ;;  %v413_v12 = vpop.f32.mrf.mxu0 }
  0xec   : > { %v699_v47 = vpop.f32.mrf.mxu1  ;;  %v2091_v13 = vpop.f32.mrf.mxu0 }
  0xee   : > { %v2649_v48 = vpop.f32.mrf.mxu1  ;;  %v423_v14 = vpop.f32.mrf.mxu0 }
  0xf0   : > { %v705_v49 = vpop.f32.mrf.mxu1  ;;  %v2094_v15 = vpop.f32.mrf.mxu0 }
  0xf2   : > { %v2651_v50 = vpop.f32.mrf.mxu1  ;;  %v433_v16 = vpop.f32.mrf.mxu0 }
  0xf4   : > { %v711_v51 = vpop.f32.mrf.mxu1  ;;  %v2097_v17 = vpop.f32.mrf.mxu0 }
  0xf6   : > { %v2653_v52 = vpop.f32.mrf.mxu1  ;;  %v443_v18 = vpop.f32.mrf.mxu0 }
  0xf8   : > { %v717_v53 = vpop.f32.mrf.mxu1  ;;  %v2100_v19 = vpop.f32.mrf.mxu0 }
  0xfa   : > { %v721_v54 = vpop.f32.mrf.mxu1  ;;  %v453_v20 = vpop.f32.mrf.mxu0 }
  0xfc   : > { %v723_v55 = vpop.f32.mrf.mxu1 }
  0xfe   : > { %v727_v56 = vpop.f32.mrf.mxu1 }
 0x100   : > { %v729_v57 = vpop.f32.mrf.mxu1 }
 0x102   : > { %v733_v58 = vpop.f32.mrf.mxu1 }
 0x104   : > { %v735_v59 = vpop.f32.mrf.mxu1 }
 0x106   : > { %v739_v60 = vpop.f32.mrf.mxu1 }
 0x108   : > { %v741_v61 = vpop.f32.mrf.mxu1 }
 0x10a   : > { %v745_v62 = vpop.f32.mrf.mxu1 }
 0x10c   : > { %v747_v63 = vpop.f32.mrf.mxu1 }
 0x10e   : > { %v751_v0 = vpop.f32.mrf.mxu1 }
 0x110   : > { %v753_v1 = vpop.f32.mrf.mxu1 }
 0x112   : > { %v757_v3 = vpop.f32.mrf.mxu1 }
 0x114   : > { %v759_v4 = vpop.f32.mrf.mxu1 }
 0x116   : > { %v763_v5 = vpop.f32.mrf.mxu1 }
 0x117   : > { %2101 = vmatprep.subr.mxu0 %v763_v5 }
 0x118   : > { %v765_v6 = vpop.f32.mrf.mxu1  ;;  %2102 = vmatpush3.xpose.msra.mxu0 %v763_v5 }
 0x119   : > { %2103 = vmatprep.subr.mxu0 %v757_v3  ;;  %2157 = vmatprep.subr.mxu1 %v765_v6 }
 0x11a   : > { %2158 = vmatpush3.msra.mxu1 %v765_v6 }
 0x11b   : > { %2159 = vmatprep.subr.mxu1 %v759_v4 }
 0x11c   : > { %2104 = vmatpush3.xpose.msra.mxu0 %v757_v3  ;;  %2160 = vmatpush3.msra.mxu1 %v759_v4 }
 0x11d   : > { %2105 = vmatprep.subr.mxu0 %v751_v0  ;;  %2161 = vmatprep.subr.mxu1 %v753_v1 }
 0x11e   : > { %2162 = vmatpush3.msra.mxu1 %v753_v1 }
 0x11f   : > { %2163 = vmatprep.subr.mxu1 %v747_v63 }
 0x120   : > { %2106 = vmatpush3.xpose.msra.mxu0 %v751_v0  ;;  %2164 = vmatpush3.msra.mxu1 %v747_v63  ;;  %v947_v63 = vadd.s32 120, %v2728_v23  ;;  %v946_v0 = vadd.s32 112, %v2728_v23 }
 0x121   : > { %2107 = vmatprep.subr.mxu0 %v745_v62  ;;  %2165 = vmatprep.subr.mxu1 %v741_v61 }
 0x122   : > { %2166 = vmatpush3.msra.mxu1 %v741_v61  ;;  %vm984_vm1 = vcmp.gt.s32.totalorder %v2730_v24, %v947_v63 }
 0x123   : > { %2167 = vmatprep.subr.mxu1 %v735_v59 }
 0x124   : > { %2108 = vmatpush3.xpose.msra.mxu0 %v745_v62  ;;  %2168 = vmatpush3.msra.mxu1 %v735_v59 }
 0x125   : > { %2109 = vmatprep.subr.mxu0 %v739_v60  ;;  %2169 = vmatprep.subr.mxu1 %v729_v57 }
 0x126   : > { %2170 = vmatpush3.msra.mxu1 %v729_v57  ;;  %v945_v57 = vadd.s32 104, %v2728_v23 }
 0x127   : > { %2171 = vmatprep.subr.mxu1 %v723_v55 }
 0x128   : > { %2110 = vmatpush3.xpose.msra.mxu0 %v739_v60  ;;  %2172 = vmatpush3.msra.mxu1 %v723_v55  ;;  %vm982_vm15 = vcmp.gt.s32.totalorder %v2730_v24, %v945_v57 }
 0x129   : > { %2111 = vmatprep.subr.mxu0 %v733_v58  ;;  %2173 = vmatprep.subr.mxu1 %v717_v53 }
 0x12a   : > { %2174 = vmatpush3.msra.mxu1 %v717_v53 }
 0x12b   : > { %2175 = vmatprep.subr.mxu1 %v711_v51 }
 0x12c   : > { %2112 = vmatpush3.xpose.msra.mxu0 %v733_v58  ;;  %2176 = vmatpush3.msra.mxu1 %v711_v51  ;;  %v943_v51 = vadd.s32 88, %v2728_v23  ;;  %v944_v58 = vadd.s32 96, %v2728_v23 }
 0x12d   : > { %2113 = vmatprep.subr.mxu0 %v727_v56  ;;  %2177 = vmatprep.subr.mxu1 %v705_v49 }
 0x12e   : > { %2178 = vmatpush3.msra.mxu1 %v705_v49  ;;  %v2452_v49 = vmov 0   ;;  %vm980_vm13 = vcmp.gt.s32.totalorder %v2730_v24, %v943_v51  ;;  %vm981_vm0 = vcmp.gt.s32.totalorder %v2730_v24, %v944_v58  ;;  %v2905_v58 = vld [vmem:[#allocation3 + $0x58] sm:$0xff] }
 0x12f   : > { %2179 = vmatprep.subr.mxu1 %v699_v47  ;;  %2273 = vset.pattern.permute.xlu0 %v2452_v49 }
 0x130   : > { %2114 = vmatpush3.xpose.msra.mxu0 %v727_v56  ;;  %2180 = vmatpush3.msra.mxu1 %v699_v47 }
 0x131   : > { %2115 = vmatprep.subr.mxu0 %v721_v54  ;;  %2181 = vmatprep.subr.mxu1 %v2645_v45 }
 0x132   : > { %2182 = vmatpush3.msra.mxu1 %v2645_v45  ;;  %v940_v45 = vadd.s32 64, %v2728_v23  ;;  %2274 = vset.pattern.permute.xlu1 %v2452_v49 }
 0x133   : > { %2183 = vmatprep.subr.mxu1 %v2641_v43 }
 0x134   : > { %2116 = vmatpush3.xpose.msra.mxu0 %v721_v54  ;;  %2184 = vmatpush3.msra.mxu1 %v2641_v43  ;;  %vm977_vm12 = vcmp.gt.s32.totalorder %v2730_v24, %v940_v45 }
 0x135   : > { %2117 = vmatprep.subr.mxu0 %v2653_v52  ;;  %2185 = vmatprep.subr.mxu1 %v2635_v39 }
 0x136   : > { %2186 = vmatpush3.msra.mxu1 %v2635_v39  ;;  %v938_v39 = vadd.s32 48, %v2728_v23 }
 0x137   : > { %2187 = vmatprep.subr.mxu1 %v2631_v37 }
 0x138   : > { %2118 = vmatpush3.xpose.msra.mxu0 %v2653_v52  ;;  %2188 = vmatpush3.msra.mxu1 %v2631_v37  ;;  %vm975_vm10 = vcmp.gt.s32.totalorder %v2730_v24, %v938_v39  ;;  %v942_v52 = vadd.s32 80, %v2728_v23 }
 0x139   : > { %2119 = vmatprep.subr.mxu0 %v2651_v50 }
 0x13a   : > { %vm979_vm14 = vcmp.gt.s32.totalorder %v2730_v24, %v942_v52 }
 0x13c   : > { %2120 = vmatpush3.xpose.msra.mxu0 %v2651_v50 }
 0x13d   : > { %2121 = vmatprep.subr.mxu0 %v2649_v48 }
 0x140   : > { %2122 = vmatpush3.xpose.msra.mxu0 %v2649_v48 }
 0x141   : > { %2123 = vmatprep.subr.mxu0 %v2647_v46 }
 0x144   : > { %2124 = vmatpush3.xpose.msra.mxu0 %v2647_v46 }
 0x145   : > { %2125 = vmatprep.subr.mxu0 %v2643_v44 }
 0x148   : > { %2126 = vmatpush3.xpose.msra.mxu0 %v2643_v44  ;;  %v941_v44 = vadd.s32 72, %v2728_v23 }
 0x149   : > { %2127 = vmatprep.subr.mxu0 %v2639_v41 }
 0x14a   : > { %vm978_vm11 = vcmp.gt.s32.totalorder %v2730_v24, %v941_v44 }
 0x14c   : > { %2128 = vmatpush3.xpose.msra.mxu0 %v2639_v41 }
 0x14d   : > { %2129 = vmatprep.subr.mxu0 %v2633_v38 }
 0x150   : > { %2130 = vmatpush3.xpose.msra.mxu0 %v2633_v38  ;;  %v939_v38 = vadd.s32 56, %v2728_v23 }
 0x151   : > { %2131 = vmatprep.subr.mxu0 %v2629_v36 }
 0x152   : > { %vm976_vm9 = vcmp.gt.s32.totalorder %v2730_v24, %v939_v38 }
 0x154   : > { %2132 = vmatpush3.xpose.msra.mxu0 %v2629_v36 }
 0x157   : > { %2134 = vmatmul.mubr.f32.vlgmr.msra.gmra.mxu0 %v2637_v40 }
 0x158   : > { %2136 = vmatprep.mubr.f32.mxu0 %v393_v8 }
 0x15b   : > { %2137 = vmatmul.mubr.f32.gmra.mxu0 %v2082_v7 }
 0x15c   : > { %2139 = vmatprep.mubr.f32.mxu0 %v403_v10 }
 0x15f   : > { %2140 = vmatmul.mubr.f32.gmra.mxu0 %v2085_v9  ;;  %v2812_v9 = vld [vmem:[#allocation3] sm:$0xff] }
 0x160   : > { %2142 = vmatprep.mubr.f32.mxu0 %v413_v12 }
 0x163   : > { %2143 = vmatmul.mubr.f32.gmra.mxu0 %v2088_v11  ;;  %v2814_v11 = vld [vmem:[#allocation3 + $0x18] sm:$0xff] }
 0x164   : > { %2145 = vmatprep.mubr.f32.mxu0 %v423_v14  ;;  %v2819_v14 = vld [vmem:[#allocation3 + $0x8] sm:$0xff] }
 0x167   : > { %2146 = vmatmul.mubr.f32.gmra.mxu0 %v2091_v13 }
 0x168   : > { %2148 = vmatprep.mubr.f32.mxu0 %v433_v16 }
 0x16b   : > { %2149 = vmatmul.mubr.f32.gmra.mxu0 %v2094_v15 }
 0x16c   : > { %2151 = vmatprep.mubr.f32.mxu0 %v443_v18  ;;  %v2829_v18 = vld [vmem:[#allocation3 + $0x10] sm:$0xff] }
 0x16f   : > { %2152 = vmatmul.mubr.f32.gmra.mxu0 %v2097_v17 }
 0x170   : > { %2154 = vmatprep.mubr.f32.mxu0 %v453_v20 }
 0x173   : > { %2155 = vmatmul.mubr.f32.gmra.mxu0 %v2100_v19 }
 0x217   : > { %v2135_v26 = vpop.f32.mrf.mxu0 }
 0x218   : > { %v2748_v35 = vsel %vm970_vm5, -1e+30, %v2135_v26 }
 0x219   : > { %v850_v29 = vpop.f32.mrf.mxu0 }
 0x21a   : > { %v2738_v30 = vsel %vm969_vm3, -1e+30, %v850_v29  ;;  %vm983_vm3 = vcmp.gt.s32.totalorder %v2730_v24, %v946_v0 }
 0x21b   : > { %1036 = vmax.xlane.f32.xlu0 %v2738_v30  ;;  %v2138_v2 = vpop.f32.mrf.mxu0 }
 0x21c   : > { %v2745_v33 = vsel %vm972_vm4, -1e+30, %v2138_v2  ;;  %v2857_v2 = vld [vmem:[#allocation3 + $0x30] sm:$0xff] }
 0x21d   : > { %1042 = vmax.xlane.f32.xlu1 %v2745_v33  ;;  %v860_v34 = vpop.f32.mrf.mxu0 }
 0x21e   : > { %v2750_v36 = vsel %vm971_vm6, -1e+30, %v860_v34  ;;  %v2867_v34 = vld [vmem:[#allocation3 + $0x38] sm:$0xff] }
 0x21f   : > { %1038 = vmax.xlane.f32.xlu0 %v2748_v35  ;;  %v2141_v37 = vpop.f32.mrf.mxu0 }
 0x220   : > { %v2758_v41 = vsel %vm974_vm7, -1e+30, %v2141_v37 }
 0x221   : > { %1040 = vmax.xlane.f32.xlu1 %v2750_v36  ;;  %v870_v40 = vpop.f32.mrf.mxu0 }
 0x222   : > { %v2760_v42 = vsel %vm973_vm8, -1e+30, %v870_v40 }
 0x223   : > { %v2144_v43 = vpop.f32.mrf.mxu0  ;;  %1044 = vmax.xlane.f32.xlu0 %v2760_v42 }
 0x224   : > { %v2768_v47 = vsel %vm976_vm9, -1e+30, %v2144_v43  ;;  %v2876_v43 = vld [vmem:[#allocation3 + $0x40] sm:$0xff] }
 0x225   : > { %1046 = vmax.xlane.f32.xlu1 %v2758_v41  ;;  %v880_v46 = vpop.f32.mrf.mxu0 }
 0x226   : > { %v2770_v48 = vsel %vm975_vm10, -1e+30, %v880_v46  ;;  %v2886_v46 = vld [vmem:[#allocation3 + $0x48] sm:$0xff] }
 0x227   : > { %v2147_v50 = vpop.f32.mrf.mxu0  ;;  %1048 = vmax.xlane.f32.xlu0 %v2770_v48 }
 0x228   : > { %v2778_v54 = vsel %vm978_vm11, -1e+30, %v2147_v50 }
 0x229   : > { %1050 = vmax.xlane.f32.xlu1 %v2768_v47  ;;  %v890_v53 = vpop.f32.mrf.mxu0 }
 0x22a   : > { %v2780_v55 = vsel %vm977_vm12, -1e+30, %v890_v53  ;;  %v2895_v53 = vld [vmem:[#allocation3 + $0x50] sm:$0xff] }
 0x22b   : > { %v2150_v56 = vpop.f32.mrf.mxu0  ;;  %1052 = vmax.xlane.f32.xlu0 %v2780_v55 }
 0x22c   : > { %v2788_v60 = vsel %vm980_vm13, -1e+30, %v2150_v56 }
 0x22d   : > { %1054 = vmax.xlane.f32.xlu1 %v2778_v54  ;;  %v900_v59 = vpop.f32.mrf.mxu0 }
 0x22e   : > { %v2790_v61 = vsel %vm979_vm14, -1e+30, %v900_v59 }
 0x22f   : > { %v2153_v62 = vpop.f32.mrf.mxu0  ;;  %1056 = vmax.xlane.f32.xlu0 %v2790_v61 }
 0x230   : > { %v2798_v3 = vsel %vm982_vm15, -1e+30, %v2153_v62 }
 0x231   : > { %1058 = vmax.xlane.f32.xlu1 %v2788_v60  ;;  %v910_v1 = vpop.f32.mrf.mxu0 }
 0x232   : > { %v2800_v4 = vsel %vm981_vm0, -1e+30, %v910_v1  ;;  %v2915_v1 = vld [vmem:[#allocation3 + $0x60] sm:$0xff] }
 0x233   : > { %v2156_v5 = vpop.f32.mrf.mxu0  ;;  %1060 = vmax.xlane.f32.xlu0 %v2800_v4 }
 0x234   : > { %v2806_v7 = vsel %vm984_vm1, -1e+30, %v2156_v5 }
 0x235   : > { %1062 = vmax.xlane.f32.xlu1 %v2798_v3  ;;  %v920_v6 = vpop.f32.mrf.mxu0 }
 0x236   : > { %v2808_v8 = vsel %vm983_vm3, -1e+30, %v920_v6 }
 0x237   : > { %1064 = vmax.xlane.f32.xlu0 %v2808_v8 }
 0x239   : > { %1066 = vmax.xlane.f32.xlu1 %v2806_v7 }
 0x2a4   : > { %v1037_v10 = vpop.xlane.xlu0 %1036 }
 0x2a5   : > { %v2817_v12 = vmax.f32 %v2812_v9, %v1037_v10  ;;  %v2925_v10 = vld [vmem:[#allocation3 + $0x68] sm:$0xff] }
 0x2a6   : > { %v1043_v13 = vpop.xlane.xlu1 %1042 }
 0x2a7   : > { %v1084_v15 = vsub.f32 %v2812_v9, %v2817_v12  ;;  %1646 = vst.msk [vmem:[#allocation3] sm:$0xff] %vm478_vm2, %v2817_v12  ;;  %v2826_v16 = vmax.f32 %v2814_v11, %v1043_v13  ;;  %1134 = vperm.xlu0 %2273, %v2817_v12  }
 0x2a8   : > { %v1039_v17 = vpop.xlane.xlu0 %1038 }
 0x2a9   : > { %1649 = vst.msk [vmem:[#allocation3 + $0x18] sm:$0xff] %vm478_vm2, %v2826_v16  ;;  %v2836_v20 = vmax.f32 %v2819_v14, %v1039_v17 }
 0x2aa   : > { %v1041_v21 = vpop.xlane.xlu1 %1040 }
 0x2ab   : > { %v1085_v23 = vsub.f32 %v2819_v14, %v2836_v20  ;;  %1647 = vst.msk [vmem:[#allocation3 + $0x8] sm:$0xff] %vm478_vm2, %v2836_v20  ;;  %v2845_v24 = vmax.f32 %v2829_v18, %v1041_v21  ;;  %1139 = vperm.xlu1 %2274, %v2836_v20  }
 0x2ac   : > { %v1045_v26 = vpop.xlane.xlu0 %1044 }
 0x2ad   : > { %v1086_v27 = vsub.f32 %v2829_v18, %v2845_v24  ;;  %1648 = vst.msk [vmem:[#allocation3 + $0x10] sm:$0xff] %vm478_vm2, %v2845_v24  ;;  %v2855_v28 = vmax.f32 %v2838_v22, %v1045_v26 }
 0x2ae   : > { %v1047_v29 = vpop.xlane.xlu1 %1046 }
 0x2af   : > { %v2860_v31 = vmax.f32 %v2848_v25, %v1047_v29  ;;  %1149 = vperm.xlu1 %2274, %v2826_v16   ;;  %1650 = vst.msk [vmem:[#allocation3 + $0x20] sm:$0xff] %vm478_vm2, %v2855_v28  ;;  %v2935_v29 = vld [vmem:[#allocation3 + $0x70] sm:$0xff]  ;;  %v3193_v14 = vsub.f32 %v2838_v22, %v2855_v28 }
 0x2b0   : > { %v1049_v37 = vpop.xlane.xlu0 %1048 }
 0x2b1   : > { %1651 = vst.msk [vmem:[#allocation3 + $0x28] sm:$0xff] %vm478_vm2, %v2860_v31  ;;  %v2874_v39 = vmax.f32 %v2857_v2, %v1049_v37  ;;  %v1108_v20 = vmul.f32 1.442695, %v3193_v14  ;;  %v3196_v9 = vsub.f32 %v2848_v25, %v2860_v31 }
 0x2b2   : > { %v1051_v40 = vpop.xlane.xlu1 %1050 }
 0x2b3   : > { %v2879_v44 = vmax.f32 %v2867_v34, %v1051_v40  ;;  %1144 = vperm.xlu1 %2274, %v2845_v24   ;;  %1652 = vst.msk [vmem:[#allocation3 + $0x30] sm:$0xff] %vm478_vm2, %v2874_v39  ;;  %v3195_v18 = vsub.f32 %v2857_v2, %v2874_v39  ;;  %v1110_v12 = vmul.f32 1.442695, %v3196_v9 }
 0x2b4   : > { %v1053_v49 = vpop.xlane.xlu0 %1052 }
 0x2b5   : > { %1653 = vst.msk [vmem:[#allocation3 + $0x38] sm:$0xff] %vm478_vm2, %v2879_v44  ;;  %v2893_v51 = vmax.f32 %v2876_v43, %v1053_v49  ;;  %v2945_v49 = vld [vmem:[#allocation3 + $0x78] sm:$0xff]  ;;  %v1112_v24 = vmul.f32 1.442695, %v3195_v18 }
 0x2b6   : > { %v1055_v52 = vpop.xlane.xlu1 %1054  ;;  %v1267_v18 = vld [vmem:[#allocation4 + $0x38] sm:$0xff] }
 0x2b7   : > { %v2898_v56 = vmax.f32 %v2886_v46, %v1055_v52  ;;  %1159 = vperm.xlu1 %2274, %v2860_v31   ;;  %1654 = vst.msk [vmem:[#allocation3 + $0x40] sm:$0xff] %vm478_vm2, %v2893_v51 }
 0x2b8   : > { %v1057_v59 = vpop.xlane.xlu0 %1056 }
 0x2b9   : > { %1655 = vst.msk [vmem:[#allocation3 + $0x48] sm:$0xff] %vm478_vm2, %v2898_v56  ;;  %1179 = vperm.xlu0 %2273, %v2898_v56   ;;  %v2913_v63 = vmax.f32 %v2895_v53, %v1057_v59  ;;  %v3200_v25 = vsub.f32 %v2886_v46, %v2898_v56 }
 0x2ba   : > { %v1059_v0 = vpop.xlane.xlu1 %1058 }
 0x2bb   : > { %v2918_v5 = vmax.f32 %v2905_v58, %v1059_v0  ;;  %1154 = vperm.xlu1 %2274, %v2855_v28   ;;  %1656 = vst.msk [vmem:[#allocation3 + $0x50] sm:$0xff] %vm478_vm2, %v2913_v63  ;;  %v3199_v28 = vsub.f32 %v2895_v53, %v2913_v63  ;;  %v1118_v31 = vmul.f32 1.442695, %v3200_v25 }
 0x2bc   : > { %v1061_v13 = vpop.xlane.xlu0 %1060 }
 0x2bd   : > { %1657 = vst.msk [vmem:[#allocation3 + $0x58] sm:$0xff] %vm478_vm2, %v2918_v5  ;;  %1189 = vperm.xlu0 %2273, %v2918_v5   ;;  %v2933_v21 = vmax.f32 %v2915_v1, %v1061_v13  ;;  %v1120_v2 = vmul.f32 1.442695, %v3199_v28 }
 0x2be   : > { %v1063_v26 = vpop.xlane.xlu1 %1062 }
 0x2bf   : > { %v2938_v37 = vmax.f32 %v2925_v10, %v1063_v26  ;;  %1169 = vperm.xlu1 %2274, %v2879_v44   ;;  %1658 = vst.msk [vmem:[#allocation3 + $0x60] sm:$0xff] %vm478_vm2, %v2933_v21 }
 0x2c0   : > { %v1065_v52 = vpop.xlane.xlu0 %1064 }
 0x2c1   : > { %1659 = vst.msk [vmem:[#allocation3 + $0x68] sm:$0xff] %vm478_vm2, %v2938_v37  ;;  %1199 = vperm.xlu0 %2273, %v2938_v37   ;;  %v2953_v0 = vmax.f32 %v2935_v29, %v1065_v52 }
 0x2c2   : > { %v1067_v13 = vpop.xlane.xlu1 %1066 }
 0x2c3   : > { %v2956_v26 = vmax.f32 %v2945_v49, %v1067_v13  ;;  %1164 = vperm.xlu1 %2274, %v2874_v39   ;;  %1660 = vst.msk [vmem:[#allocation3 + $0x70] sm:$0xff] %vm478_vm2, %v2953_v0  ;;  %v3203_v46 = vsub.f32 %v2935_v29, %v2953_v0 }
 0x2c5   : > { %1661 = vst.msk [vmem:[#allocation3 + $0x78] sm:$0xff] %vm478_vm2, %v2956_v26  ;;  %1209 = vperm.xlu0 %2273, %v2956_v26   ;;  %v1128_v56 = vmul.f32 1.442695, %v3203_v46  ;;  %v3205_v29 = vsub.f32 %v2945_v49, %v2956_v26 }
 0x2c7   : > { %1174 = vperm.xlu1 %2274, %v2893_v51  }
 0x2cb   : > { %1184 = vperm.xlu1 %2274, %v2913_v63  }
 0x2cf   : > { %1194 = vperm.xlu1 %2274, %v2933_v21  }
 0x2d3   : > { %1204 = vperm.xlu1 %2274, %v2953_v0   ;;  %v1130_v0 = vmul.f32 1.442695, %v3205_v29 }
 0x322   : > { %v1135_v52 = vpop.permute.xlu0 %1134 }
 0x323   : > { %v1212_v13 = vsub.f32 %v2738_v30, %v1135_v52 }
 0x325   : > { %v1228_v17 = vmul.f32 1.442695, %v1212_v13 }
 0x326   : > { %v1140_v40 = vpop.permute.xlu1 %1139 }
 0x327   : > { %2276 = vpow2.f32 %v1228_v17  ;;  %v1213_v59 = vsub.f32 %v2748_v35, %v1140_v40 }
 0x329   : > { %v1230_v62 = vmul.f32 1.442695, %v1213_v59 }
 0x32a   : > { %v1150_v6 = vpop.permute.xlu1 %1149 }
 0x32b   : > { %2278 = vpow2.f32 %v1230_v62  ;;  %v1215_v50 = vsub.f32 %v2745_v33, %v1150_v6 }
 0x32d   : > { %v1234_v57 = vmul.f32 1.442695, %v1215_v50 }
 0x32e   : > { %v1145_v38 = vpop.permute.xlu1 %1144 }
 0x32f   : > { %2280 = vpow2.f32 %v1234_v57  ;;  %v1214_v45 = vsub.f32 %v2750_v36, %v1145_v38 }
 0x331   : > { %v1232_v19 = vmul.f32 1.442695, %v1214_v45 }
 0x332   : > { %v1160_v32 = vpop.permute.xlu1 %1159 }
 0x333   : > { %2282 = vpow2.f32 %v1232_v19  ;;  %v1217_v30 = vsub.f32 %v2758_v41, %v1160_v32 }
 0x334   : > { %v2277_v52 = vpop.eup %2276  ;;  %v1180_v13 = vpop.permute.xlu0 %1179 }
 0x335   : > { %v1238_v17 = vmul.f32 1.442695, %v1217_v30  ;;  %1292 = vadd.xlane.f32.xlu1 %v2277_v52  ;;  %2189 = vmatprep.mubr.f32.mxu1 %v2277_v52  ;;  %v1221_v41 = vsub.f32 %v2778_v54, %v1180_v13 }
 0x336   : > { %v1155_v35 = vpop.permute.xlu1 %1154 }
 0x337   : > { %2284 = vpow2.f32 %v1238_v17  ;;  %v1216_v62 = vsub.f32 %v2760_v42, %v1155_v35  ;;  %v1246_v59 = vmul.f32 1.442695, %v1221_v41 }
 0x338   : > { %v2279_v33 = vpop.eup %2278  ;;  %v1190_v6 = vpop.permute.xlu0 %1189 }
 0x339   : > { %v1236_v50 = vmul.f32 1.442695, %v1216_v62  ;;  %1294 = vadd.xlane.f32.xlu0 %v2279_v33  ;;  %2190 = vmatmul.mubr.f32.vlgmr.msra.gmra.mxu1 %v2279_v33  ;;  %v1223_v30 = vsub.f32 %v2788_v60, %v1190_v6 }
 0x33a   : > { %v1170_v36 = vpop.permute.xlu1 %1169 }
 0x33b   : > { %2286 = vpow2.f32 %v1236_v50  ;;  %v1219_v19 = vsub.f32 %v2768_v47, %v1170_v36  ;;  %v1250_v13 = vmul.f32 1.442695, %v1223_v30 }
 0x33c   : > { %v2281_v38 = vpop.eup %2280  ;;  %v1200_v57 = vpop.permute.xlu0 %1199 }
 0x33d   : > { %v1242_v32 = vmul.f32 1.442695, %v1219_v19  ;;  %1298 = vadd.xlane.f32.xlu1 %v2281_v38  ;;  %v1225_v35 = vsub.f32 %v2798_v3, %v1200_v57 }
 0x33e   : > { %v1165_v45 = vpop.permute.xlu1 %1164 }
 0x33f   : > { %2288 = vpow2.f32 %v1242_v32  ;;  %v1218_v40 = vsub.f32 %v2770_v48, %v1165_v45  ;;  %v1254_v6 = vmul.f32 1.442695, %v1225_v35 }
 0x340   : > { %v2283_v42 = vpop.eup %2282  ;;  %v1210_v62 = vpop.permute.xlu0 %1209 }
 0x341   : > { %v1240_v52 = vmul.f32 1.442695, %v1218_v40  ;;  %1296 = vadd.xlane.f32.xlu0 %v2283_v42  ;;  %2192 = vmatprep.mubr.f32.mxu1 %v2283_v42  ;;  %v1227_v36 = vsub.f32 %v2806_v7, %v1210_v62 }
 0x342   : > { %v1175_v17 = vpop.permute.xlu1 %1174  ;;  %2193 = vmatmul.mubr.f32.gmra.mxu1 %v2281_v38 }
 0x343   : > { %2290 = vpow2.f32 %v1240_v52  ;;  %v1220_v47 = vsub.f32 %v2780_v55, %v1175_v17  ;;  %v1258_v41 = vmul.f32 1.442695, %v1227_v36  ;;  %v1102_v17 = vmul.f32 1.442695, %v1085_v23  ;;  %v1260_v36 = vld [vmem:[#allocation4] sm:$0xff] }
 0x344   : > { %v2285_v54 = vpop.eup %2284  ;;  %2292 = vpow2.f32 %v1246_v59  ;;  %v3194_v23 = vsub.f32 %v2814_v11, %v2826_v16  ;;  %v3198_v11 = vsub.f32 %v2867_v34, %v2879_v44  ;;  %v3202_v44 = vsub.f32 %v2905_v58, %v2918_v5 }
 0x345   : > { %v1244_v33 = vmul.f32 1.442695, %v1220_v47  ;;  %1302 = vadd.xlane.f32.xlu1 %v2285_v54 }
 0x346   : > { %v1185_v48 = vpop.permute.xlu1 %1184  ;;  %v1106_v35 = vmul.f32 1.442695, %v3194_v23  ;;  %v1114_v16 = vmul.f32 1.442695, %v3198_v11  ;;  %v1122_v53 = vmul.f32 1.442695, %v3202_v44 }
 0x347   : > { %2294 = vpow2.f32 %v1244_v33  ;;  %v1222_v60 = vsub.f32 %v2790_v61, %v1185_v48 }
 0x348   : > { %v2287_v50 = vpop.eup %2286  ;;  %2296 = vpow2.f32 %v1250_v13  ;;  %v1100_v13 = vmul.f32 1.442695, %v1084_v15  ;;  %v3197_v15 = vsub.f32 %v2876_v43, %v2893_v51  ;;  %v3201_v51 = vsub.f32 %v2915_v1, %v2933_v21 }
 0x349   : > { %v1248_v19 = vmul.f32 1.442695, %v1222_v60  ;;  %1300 = vadd.xlane.f32.xlu0 %v2287_v50  ;;  %2195 = vmatprep.mubr.f32.mxu1 %v2287_v50  ;;  %v3204_v21 = vsub.f32 %v2925_v10, %v2938_v37 }
 0x34a   : > { %v1195_v55 = vpop.permute.xlu1 %1194  ;;  %2196 = vmatmul.mubr.f32.gmra.mxu1 %v2285_v54  ;;  %v1104_v54 = vmul.f32 1.442695, %v1086_v27  ;;  %v1116_v22 = vmul.f32 1.442695, %v3197_v15  ;;  %v1124_v62 = vmul.f32 1.442695, %v3201_v51 }
 0x34b   : > { %2298 = vpow2.f32 %v1248_v19  ;;  %v1224_v3 = vsub.f32 %v2800_v4, %v1195_v55  ;;  %v1126_v48 = vmul.f32 1.442695, %v3204_v21 }
 0x34c   : > { %v2289_v38 = vpop.eup %2288  ;;  %2300 = vpow2.f32 %v1254_v6 }
 0x34d   : > { %v1252_v32 = vmul.f32 1.442695, %v1224_v3  ;;  %1306 = vadd.xlane.f32.xlu1 %v2289_v38  ;;  %v1261_v3 = vld [vmem:[#allocation4 + $0x8] sm:$0xff] }
 0x34e   : > { %v1205_v45 = vpop.permute.xlu1 %1204 }
 0x34f   : > { %2302 = vpow2.f32 %v1252_v32  ;;  %v1226_v61 = vsub.f32 %v2808_v8, %v1205_v45  ;;  %v1263_v45 = vld [vmem:[#allocation4 + $0x18] sm:$0xff] }
 0x350   : > { %v2291_v57 = vpop.eup %2290  ;;  %2304 = vpow2.f32 %v1258_v41 }
 0x351   : > { %v2293_v7 = vpop.eup %2292  ;;  %v1256_v40 = vmul.f32 1.442695, %v1226_v61  ;;  %1304 = vadd.xlane.f32.xlu0 %v2291_v57  ;;  %2198 = vmatprep.mubr.f32.mxu1 %v2291_v57 }
 0x352   : > { %1310 = vadd.xlane.f32.xlu1 %v2293_v7  ;;  %2199 = vmatmul.mubr.f32.gmra.mxu1 %v2289_v38 }
 0x353   : > { %2306 = vpow2.f32 %v1256_v40  ;;  %v1262_v40 = vld [vmem:[#allocation4 + $0x10] sm:$0xff] }
 0x354   : > { %v2295_v42 = vpop.eup %2294  ;;  %2308 = vpow2.f32 %v1102_v17 }
 0x355   : > { %v2297_v4 = vpop.eup %2296  ;;  %1308 = vadd.xlane.f32.xlu0 %v2295_v42  ;;  %2201 = vmatprep.mubr.f32.mxu1 %v2295_v42  ;;  %2310 = vpow2.f32 %v1104_v54 }
 0x356   : > { %1314 = vadd.xlane.f32.xlu1 %v2297_v4  ;;  %2202 = vmatmul.mubr.f32.gmra.mxu1 %v2293_v7  ;;  %2312 = vpow2.f32 %v1100_v13  ;;  %v1264_v13 = vld [vmem:[#allocation4 + $0x20] sm:$0xff] }
 0x357   : > { %2314 = vpow2.f32 %v1108_v20 }
 0x358   : > { %v2299_v59 = vpop.eup %2298  ;;  %2316 = vpow2.f32 %v1106_v35 }
 0x359   : > { %v2301_v30 = vpop.eup %2300  ;;  %1312 = vadd.xlane.f32.xlu0 %v2299_v59  ;;  %2204 = vmatprep.mubr.f32.mxu1 %v2299_v59  ;;  %2318 = vpow2.f32 %v1112_v24 }
 0x35a   : > { %1318 = vadd.xlane.f32.xlu1 %v2301_v30  ;;  %2205 = vmatmul.mubr.f32.gmra.mxu1 %v2297_v4  ;;  %2320 = vpow2.f32 %v1110_v12 }
 0x35b   : > { %2322 = vpow2.f32 %v1116_v22 }
 0x35c   : > { %v2303_v8 = vpop.eup %2302  ;;  %2324 = vpow2.f32 %v1114_v16  ;;  %v1269_v16 = vld [vmem:[#allocation4 + $0x48] sm:$0xff] }
 0x35d   : > { %v2305_v52 = vpop.eup %2304  ;;  %1316 = vadd.xlane.f32.xlu0 %v2303_v8  ;;  %2207 = vmatprep.mubr.f32.mxu1 %v2303_v8  ;;  %2326 = vpow2.f32 %v1120_v2  ;;  %v1265_v8 = vld [vmem:[#allocation4 + $0x28] sm:$0xff] }
 0x35e   : > { %1322 = vadd.xlane.f32.xlu1 %v2305_v52  ;;  %2208 = vmatmul.mubr.f32.gmra.mxu1 %v2301_v30  ;;  %2328 = vpow2.f32 %v1118_v31 }
 0x35f   : > { %2330 = vpow2.f32 %v1124_v62 }
 0x360   : > { %v2307_v47 = vpop.eup %2306  ;;  %2332 = vpow2.f32 %v1122_v53 }
 0x361   : > { %1320 = vadd.xlane.f32.xlu0 %v2307_v47  ;;  %2210 = vmatprep.mubr.f32.mxu1 %v2307_v47  ;;  %v2309_v27 = vpop.eup %2308  ;;  %2334 = vpow2.f32 %v1128_v56 }
 0x362   : > { %2211 = vmatmul.mubr.f32.gmra.mxu1 %v2305_v52  ;;  %v2311_v39 = vpop.eup %2310  ;;  %2336 = vpow2.f32 %v1126_v48  ;;  %v1277_v41 = vmul.f32 %v2309_v27, %v1261_v3 }
 0x363   : > { %v2313_v43 = vpop.eup %2312  ;;  %2338 = vpow2.f32 %v1130_v0  ;;  %v1278_v59 = vmul.f32 %v2311_v39, %v1262_v40 }
 0x364   : > { %v3024_v34 = vpop.eup %2314  ;;  %v1276_v19 = vmul.f32 %v2313_v43, %v1260_v36 }
 0x365   : > { %v2317_v63 = vpop.eup %2316  ;;  %v1280_v23 = vmul.f32 %v3024_v34, %v1264_v13 }
 0x366   : > { %v3033_v33 = vpop.eup %2318  ;;  %v1279_v57 = vmul.f32 %v2317_v63, %v1263_v45 }
 0x367   : > { %v2321_v1 = vpop.eup %2320 }
 0x368   : > { %v3039_v58 = vpop.eup %2322  ;;  %v1281_v47 = vmul.f32 %v2321_v1, %v1265_v8 }
 0x369   : > { %v2325_v5 = vpop.eup %2324 }
 0x36a   : > { %v3045_v60 = vpop.eup %2326  ;;  %v1283_v12 = vmul.f32 %v2325_v5, %v1267_v18 }
 0x36b   : > { %v3048_v50 = vpop.eup %2328 }
 0x36c   : > { %v3050_v10 = vpop.eup %2330  ;;  %v1285_v25 = vmul.f32 %v3048_v50, %v1269_v16 }
 0x36d   : > { %v3054_v37 = vpop.eup %2332 }
 0x36e   : > { %v3056_v6 = vpop.eup %2334 }
 0x36f   : > { %1380 = vperm.xlu1 %2274, %v2309_v27   ;;  %v3060_v49 = vpop.eup %2336  ;;  %v1266_v27 = vld [vmem:[#allocation4 + $0x30] sm:$0xff] }
 0x370   : > { %v3063_v26 = vpop.eup %2338  ;;  %v1282_v2 = vmul.f32 %v3033_v33, %v1266_v27 }
 0x373   : > { %1385 = vperm.xlu1 %2274, %v2311_v39  }
 0x377   : > { %1395 = vperm.xlu1 %2274, %v3024_v34   ;;  %1375 = vperm.xlu0 %2273, %v2313_v43   ;;  %v1268_v43 = vld [vmem:[#allocation4 + $0x40] sm:$0xff]  ;;  %v1271_v34 = vld [vmem:[#allocation4 + $0x58] sm:$0xff] }
 0x378   : > { %v1287_v56 = vmul.f32 %v3054_v37, %v1271_v34 }
 0x37b   : > { %1405 = vperm.xlu1 %2274, %v3033_v33   ;;  %1390 = vperm.xlu0 %2273, %v2317_v63   ;;  %v1284_v63 = vmul.f32 %v3039_v58, %v1268_v43 }
 0x37f   : > { %1415 = vperm.xlu1 %2274, %v3039_v58   ;;  %1400 = vperm.xlu0 %2273, %v2321_v1   ;;  %v1270_v1 = vld [vmem:[#allocation4 + $0x50] sm:$0xff] }
 0x383   : > { %1425 = vperm.xlu1 %2274, %v3045_v60   ;;  %1410 = vperm.xlu0 %2273, %v2325_v5   ;;  %v1273_v5 = vld [vmem:[#allocation4 + $0x68] sm:$0xff] }
 0x384   : > { %v1289_v36 = vmul.f32 %v3060_v49, %v1273_v5 }
 0x387   : > { %1435 = vperm.xlu1 %2274, %v3050_v10   ;;  %1420 = vperm.xlu0 %2273, %v3048_v50   ;;  %v1286_v50 = vmul.f32 %v3045_v60, %v1270_v1 }
 0x38b   : > { %1445 = vperm.xlu1 %2274, %v3056_v6   ;;  %1430 = vperm.xlu0 %2273, %v3054_v37   ;;  %v1272_v37 = vld [vmem:[#allocation4 + $0x60] sm:$0xff] }
 0x38c   : > { %v1288_v45 = vmul.f32 %v3050_v10, %v1272_v37 }
 0x38f   : > { %1440 = vperm.xlu0 %2273, %v3060_v49  }
 0x393   : > { %1450 = vperm.xlu0 %2273, %v3063_v26  }
 0x3be   : > { %v1293_v55 = vpop.xlane.xlu1 %1292 }
 0x3bf   : > { %v1324_v38 = vadd.f32 %v1293_v55, %v1276_v19 }
 0x3c1   : > { %1341 = vst.msk [vmem:[#allocation4] sm:$0xff] %vm478_vm2, %v1324_v38  ;;  %v1275_v38 = vld [vmem:[#allocation4 + $0x78] sm:$0xff] }
 0x3c2   : > { %v1295_v32 = vpop.xlane.xlu0 %1294 }
 0x3c3   : > { %v1325_v61 = vadd.f32 %v1295_v32, %v1277_v41 }
 0x3c5   : > { %1342 = vst.msk [vmem:[#allocation4 + $0x8] sm:$0xff] %vm478_vm2, %v1325_v61 }
 0x3c6   : > { %v1299_v7 = vpop.xlane.xlu1 %1298 }
 0x3c7   : > { %v1327_v42 = vadd.f32 %v1299_v7, %v1279_v57  ;;  %v1291_v57 = vmul.f32 %v3063_v26, %v1275_v38  ;;  %v1274_v7 = vld [vmem:[#allocation4 + $0x70] sm:$0xff] }
 0x3c8   : > { %v1665_v4 = vld [vmem:[#allocation4] sm:$0xff] }
 0x3c9   : > { %1344 = vst.msk [vmem:[#allocation4 + $0x18] sm:$0xff] %vm478_vm2, %v1327_v42  ;;  %2340 = vrcp.f32 %v1665_v4 }
 0x3ca   : > { %v1297_v30 = vpop.xlane.xlu0 %1296 }
 0x3cb   : > { %v1326_v52 = vadd.f32 %v1297_v30, %v1278_v59  ;;  %v1290_v30 = vmul.f32 %v3056_v6, %v1274_v7 }
 0x3cc   : > { %v1666_v17 = vld [vmem:[#allocation4 + $0x8] sm:$0xff] }
 0x3cd   : > { %1343 = vst.msk [vmem:[#allocation4 + $0x10] sm:$0xff] %vm478_vm2, %v1326_v52  ;;  %2342 = vrcp.f32 %v1666_v17 }
 0x3ce   : > { %v1303_v54 = vpop.xlane.xlu1 %1302 }
 0x3cf   : > { %v1329_v14 = vadd.f32 %v1303_v54, %v1281_v47 }
 0x3d0   : > { %v1668_v20 = vld [vmem:[#allocation4 + $0x18] sm:$0xff] }
 0x3d1   : > { %1346 = vst.msk [vmem:[#allocation4 + $0x28] sm:$0xff] %vm478_vm2, %v1329_v14  ;;  %2344 = vrcp.f32 %v1668_v20 }
 0x3d2   : > { %v1301_v35 = vpop.xlane.xlu0 %1300 }
 0x3d3   : > { %v1328_v24 = vadd.f32 %v1301_v35, %v1280_v23 }
 0x3d4   : > { %v1667_v9 = vld [vmem:[#allocation4 + $0x10] sm:$0xff] }
 0x3d5   : > { %1345 = vst.msk [vmem:[#allocation4 + $0x20] sm:$0xff] %vm478_vm2, %v1328_v24  ;;  %2346 = vrcp.f32 %v1667_v9 }
 0x3d6   : > { %v2341_v15 = vpop.eup %2340  ;;  %v1307_v22 = vpop.xlane.xlu1 %1306 }
 0x3d7   : > { %v1331_v11 = vadd.f32 %v1307_v22, %v1283_v12  ;;  %1715 = vperm.xlu1 %2274, %v2341_v15  }
 0x3d8   : > { %v1670_v28 = vld [vmem:[#allocation4 + $0x28] sm:$0xff] }
 0x3d9   : > { %1348 = vst.msk [vmem:[#allocation4 + $0x38] sm:$0xff] %vm478_vm2, %v1331_v11  ;;  %2348 = vrcp.f32 %v1670_v28 }
 0x3da   : > { %v2343_v39 = vpop.eup %2342  ;;  %v1305_v31 = vpop.xlane.xlu0 %1304 }
 0x3db   : > { %v1311_v51 = vpop.xlane.xlu1 %1310  ;;  %v1330_v62 = vadd.f32 %v1305_v31, %v1282_v2  ;;  %1720 = vperm.xlu0 %2273, %v2343_v39  }
 0x3dc   : > { %v1333_v44 = vadd.f32 %v1311_v51, %v1285_v25  ;;  %v1669_v53 = vld [vmem:[#allocation4 + $0x20] sm:$0xff] }
 0x3dd   : > { %1347 = vst.msk [vmem:[#allocation4 + $0x30] sm:$0xff] %vm478_vm2, %v1330_v62  ;;  %2350 = vrcp.f32 %v1669_v53 }
 0x3de   : > { %v2345_v46 = vpop.eup %2344  ;;  %1350 = vst.msk [vmem:[#allocation4 + $0x48] sm:$0xff] %vm478_vm2, %v1333_v44  ;;  %v1309_v33 = vpop.xlane.xlu0 %1308 }
 0x3df   : > { %v1315_v21 = vpop.xlane.xlu1 %1314  ;;  %v1332_v48 = vadd.f32 %v1309_v33, %v1284_v63  ;;  %1730 = vperm.xlu0 %2273, %v2345_v46  }
 0x3e0   : > { %v1335_v29 = vadd.f32 %v1315_v21, %v1287_v56  ;;  %v1672_v0 = vld [vmem:[#allocation4 + $0x38] sm:$0xff] }
 0x3e1   : > { %1349 = vst.msk [vmem:[#allocation4 + $0x40] sm:$0xff] %vm478_vm2, %v1332_v48  ;;  %2352 = vrcp.f32 %v1672_v0 }
 0x3e2   : > { %v2347_v58 = vpop.eup %2346  ;;  %1352 = vst.msk [vmem:[#allocation4 + $0x58] sm:$0xff] %vm478_vm2, %v1335_v29  ;;  %v1313_v19 = vpop.xlane.xlu0 %1312 }
 0x3e3   : > { %v1319_v55 = vpop.xlane.xlu1 %1318  ;;  %v1334_v3 = vadd.f32 %v1313_v19, %v1286_v50  ;;  %1725 = vperm.xlu1 %2274, %v2347_v58  }
 0x3e4   : > { %v1337_v41 = vadd.f32 %v1319_v55, %v1289_v36  ;;  %v1671_v32 = vld [vmem:[#allocation4 + $0x30] sm:$0xff] }
 0x3e5   : > { %1351 = vst.msk [vmem:[#allocation4 + $0x50] sm:$0xff] %vm478_vm2, %v1334_v3  ;;  %v1674_v61 = vld [vmem:[#allocation4 + $0x48] sm:$0xff]  ;;  %2354 = vrcp.f32 %v1671_v32 }
 0x3e6   : > { %v2349_v60 = vpop.eup %2348  ;;  %1354 = vst.msk [vmem:[#allocation4 + $0x68] sm:$0xff] %vm478_vm2, %v1337_v41  ;;  %v1317_v49 = vpop.xlane.xlu0 %1316  ;;  %2356 = vrcp.f32 %v1674_v61 }
 0x3e7   : > { %v1323_v40 = vpop.xlane.xlu1 %1322  ;;  %v1336_v42 = vadd.f32 %v1317_v49, %v1288_v45  ;;  %1740 = vperm.xlu0 %2273, %v2349_v60  }
 0x3e8   : > { %v1339_v4 = vadd.f32 %v1323_v40, %v1291_v57  ;;  %v1673_v59 = vld [vmem:[#allocation4 + $0x40] sm:$0xff] }
 0x3e9   : > { %1353 = vst.msk [vmem:[#allocation4 + $0x60] sm:$0xff] %vm478_vm2, %v1336_v42  ;;  %v1676_v10 = vld [vmem:[#allocation4 + $0x58] sm:$0xff]  ;;  %2358 = vrcp.f32 %v1673_v59 }
 0x3ea   : > { %v2351_v8 = vpop.eup %2350  ;;  %1356 = vst.msk [vmem:[#allocation4 + $0x78] sm:$0xff] %vm478_vm2, %v1339_v4  ;;  %v1321_v52 = vpop.xlane.xlu0 %1320  ;;  %2360 = vrcp.f32 %v1676_v10 }
 0x3eb   : > { %v1338_v26 = vadd.f32 %v1321_v52, %v1290_v30  ;;  %1735 = vperm.xlu1 %2274, %v2351_v8   ;;  %v1381_v27 = vpop.permute.xlu1 %1380 }
 0x3ec   : > { %v1675_v17 = vld [vmem:[#allocation4 + $0x50] sm:$0xff]  ;;  %v1454_v50 = vmul.f32 0.0, %v1381_v27 }
 0x3ed   : > { %1355 = vst.msk [vmem:[#allocation4 + $0x70] sm:$0xff] %vm478_vm2, %v1338_v26  ;;  %v1678_v47 = vld [vmem:[#allocation4 + $0x68] sm:$0xff]  ;;  %2362 = vrcp.f32 %v1675_v17 }
 0x3ee   : > { %v2353_v54 = vpop.eup %2352  ;;  %2364 = vrcp.f32 %v1678_v47 }
 0x3ef   : > { %1750 = vperm.xlu0 %2273, %v2353_v54   ;;  %v1386_v16 = vpop.permute.xlu1 %1385 }
 0x3f0   : > { %v1677_v13 = vld [vmem:[#allocation4 + $0x60] sm:$0xff]  ;;  %v1455_v61 = vmul.f32 0.0, %v1386_v16 }
 0x3f1   : > { %v1680_v14 = vld [vmem:[#allocation4 + $0x78] sm:$0xff]  ;;  %2366 = vrcp.f32 %v1677_v13 }
 0x3f2   : > { %v2355_v6 = vpop.eup %2354  ;;  %2368 = vrcp.f32 %v1680_v14  ;;  %v1376_v11 = vpop.permute.xlu0 %1375 }
 0x3f3   : > { %v2357_v20 = vpop.eup %2356  ;;  %1745 = vperm.xlu1 %2274, %v2355_v6   ;;  %v1396_v2 = vpop.permute.xlu1 %1395  ;;  %v1453_v21 = vmul.f32 0.0, %v1376_v11 }
 0x3f4   : > { %1760 = vperm.xlu0 %2273, %v2357_v20   ;;  %v1679_v23 = vld [vmem:[#allocation4 + $0x70] sm:$0xff]  ;;  %v1457_v10 = vmul.f32 0.0, %v1396_v2 }
 0x3f5   : > { %2370 = vrcp.f32 %v1679_v23 }
 0x3f6   : > { %v2359_v35 = vpop.eup %2358  ;;  %v1391_v28 = vpop.permute.xlu0 %1390 }
 0x3f7   : > { %v2361_v18 = vpop.eup %2360  ;;  %1755 = vperm.xlu1 %2274, %v2359_v35   ;;  %v1406_v25 = vpop.permute.xlu1 %1405  ;;  %v1456_v3 = vmul.f32 0.0, %v1391_v28 }
 0x3f8   : > { %1770 = vperm.xlu0 %2273, %v2361_v18   ;;  %v1459_v20 = vmul.f32 0.0, %v1406_v25 }
 0x3f9   : > { %v2191_v34 = vpop.f32.mrf.mxu1 }
 0x3fa   : > { %v2363_v24 = vpop.eup %2362  ;;  %v1401_v39 = vpop.permute.xlu0 %1400  ;;  %v1615_v19 = vadd.f32 %v2191_v34, %v1454_v50 }
 0x3fb   : > { %v2365_v9 = vpop.eup %2364  ;;  %1765 = vperm.xlu1 %2274, %v2363_v24   ;;  %v3092_v43 = vpop.permute.xlu1 %1415  ;;  %v1458_v40 = vmul.f32 0.0, %v1401_v39 }
 0x3fc   : > { %1780 = vperm.xlu0 %2273, %v2365_v9   ;;  %v1535_v53 = vpop.f32.mrf.mxu1 }
 0x3fd   : > { %v1614_v5 = vadd.f32 %v1535_v53, %v1453_v21 }
 0x3fe   : > { %v2367_v12 = vpop.eup %2366  ;;  %v1411_v31 = vpop.permute.xlu0 %1410 }
 0x3ff   : > { %v2369_v15 = vpop.eup %2368  ;;  %1775 = vperm.xlu1 %2274, %v2367_v12   ;;  %v3094_v62 = vpop.permute.xlu1 %1425  ;;  %v1460_v47 = vmul.f32 0.0, %v1411_v31 }
 0x400   : > { %1790 = vperm.xlu0 %2273, %v2369_v15   ;;  %v1461_v15 = vmul.f32 0.0, %v3092_v43  ;;  %v1463_v31 = vmul.f32 0.0, %v3094_v62 }
 0x402   : > { %v2371_v22 = vpop.eup %2370  ;;  %v1421_v51 = vpop.permute.xlu0 %1420 }
 0x403   : > { %1785 = vperm.xlu1 %2274, %v2371_v22   ;;  %v3096_v63 = vpop.permute.xlu1 %1435  ;;  %v2194_v46 = vpop.f32.mrf.mxu1  ;;  %v1462_v35 = vmul.f32 0.0, %v1421_v51 }
 0x404   : > { %v1617_v41 = vadd.f32 %v2194_v46, %v1456_v3 }
 0x405   : > { %v1545_v33 = vpop.f32.mrf.mxu1 }
 0x406   : > { %v1431_v44 = vpop.permute.xlu0 %1430  ;;  %v1616_v57 = vadd.f32 %v1545_v33, %v1455_v61 }
 0x407   : > { %v3101_v1 = vpop.permute.xlu1 %1445  ;;  %v1464_v11 = vmul.f32 0.0, %v1431_v44 }
 0x40a   : > { %v3098_v56 = vpop.permute.xlu0 %1440  ;;  %v2197_v48 = vpop.f32.mrf.mxu1 }
 0x40b   : > { %v1619_v4 = vadd.f32 %v2197_v48, %v1458_v40  ;;  %v1466_v53 = vmul.f32 0.0, %v3098_v56  ;;  %v1465_v48 = vmul.f32 0.0, %v3096_v63 }
 0x40c   : > { %v1555_v36 = vpop.f32.mrf.mxu1 }
 0x40d   : > { %v1618_v52 = vadd.f32 %v1555_v36, %v1457_v10 }
 0x40e   : > { %v3105_v29 = vpop.permute.xlu0 %1450 }
 0x40f   : > { %v1468_v62 = vmul.f32 0.0, %v3105_v29 }
 0x412   : > { %v2200_v37 = vpop.f32.mrf.mxu1 }
 0x413   : > { %v1621_v13 = vadd.f32 %v2200_v37, %v1460_v47  ;;  %v1467_v37 = vmul.f32 0.0, %v3101_v1 }
 0x414   : > { %v1565_v32 = vpop.f32.mrf.mxu1 }
 0x415   : > { %v1620_v18 = vadd.f32 %v1565_v32, %v1459_v20 }
 0x416   : > { %v2203_v49 = vpop.f32.mrf.mxu1 }
 0x417   : > { %v1623_v24 = vadd.f32 %v2203_v49, %v1462_v35 }
 0x418   : > { %v1575_v59 = vpop.f32.mrf.mxu1 }
 0x419   : > { %v1622_v28 = vadd.f32 %v1575_v59, %v1461_v15 }
 0x41a   : > { %v2206_v26 = vpop.f32.mrf.mxu1 }
 0x41b   : > { %v1625_v2 = vadd.f32 %v2206_v26, %v1464_v11 }
 0x41c   : > { %v1585_v14 = vpop.f32.mrf.mxu1 }
 0x41d   : > { %v1624_v46 = vadd.f32 %v1585_v14, %v1463_v31 }
 0x41e   : > { %v2209_v9 = vpop.f32.mrf.mxu1 }
 0x41f   : > { %v1627_v44 = vadd.f32 %v2209_v9, %v1466_v53 }
 0x420   : > { %v1595_v39 = vpop.f32.mrf.mxu1 }
 0x421   : > { %v1626_v56 = vadd.f32 %v1595_v39, %v1465_v48 }
 0x422   : > { %v2212_v33 = vpop.f32.mrf.mxu1 }
 0x424   : > { %v1605_v36 = vpop.f32.mrf.mxu1 }
 0x452   : > { %v1716_v0 = vpop.permute.xlu1 %1715 }
 0x453   : > { %v1793_v58 = vmul.f32 %v1716_v0, %v1614_v5 }
 0x455   : > { %1809 = vst [vmem:[%s3107_s19] sm:$0xff] %v1793_v58  ;;  %v1629_v58 = vadd.f32 %v2212_v33, %v1468_v62 }
 0x456   : > { %v1721_v55 = vpop.permute.xlu0 %1720 }
 0x457   : > { %v1794_v38 = vmul.f32 %v1721_v55, %v1615_v19 }
 0x459   : > { %1810 = vst [vmem:[%s3107_s19 + $0x8] sm:$0xff] %v1794_v38  ;;  %v1628_v38 = vadd.f32 %v1605_v36, %v1467_v37 }
 0x45a   : > { %v1731_v45 = vpop.permute.xlu0 %1730 }
 0x45b   : > { %v1796_v60 = vmul.f32 %v1731_v45, %v1617_v41 }
 0x45d   : > { %1812 = vst [vmem:[%s3107_s19 + $0x18] sm:$0xff] %v1796_v60 }
 0x45e   : > { %v1726_v7 = vpop.permute.xlu1 %1725 }
 0x45f   : > { %v1795_v42 = vmul.f32 %v1726_v7, %v1616_v57 }
 0x461   : > { %1811 = vst [vmem:[%s3107_s19 + $0x10] sm:$0xff] %v1795_v42 }
 0x462   : > { %v1741_v30 = vpop.permute.xlu0 %1740 }
 0x463   : > { %v1798_v8 = vmul.f32 %v1741_v30, %v1619_v4 }
 0x465   : > { %1814 = vst [vmem:[%s3107_s19 + $0x28] sm:$0xff] %v1798_v8 }
 0x466   : > { %v1736_v17 = vpop.permute.xlu1 %1735 }
 0x467   : > { %v1797_v54 = vmul.f32 %v1736_v17, %v1618_v52 }
 0x469   : > { %1813 = vst [vmem:[%s3107_s19 + $0x20] sm:$0xff] %v1797_v54 }
 0x46a   : > { %v1751_v6 = vpop.permute.xlu0 %1750 }
 0x46b   : > { %v1800_v23 = vmul.f32 %v1751_v6, %v1621_v13 }
 0x46d   : > { %1816 = vst [vmem:[%s3107_s19 + $0x38] sm:$0xff] %v1800_v23 }
 0x46e   : > { %v1746_v12 = vpop.permute.xlu1 %1745 }
 0x46f   : > { %v1799_v22 = vmul.f32 %v1746_v12, %v1620_v18  ;;  %v1761_v27 = vpop.permute.xlu0 %1760 }
 0x470   : > { %v1802_v16 = vmul.f32 %v1761_v27, %v1623_v24 }
 0x471   : > { %1815 = vst [vmem:[%s3107_s19 + $0x30] sm:$0xff] %v1799_v22 }
 0x472   : > { %1818 = vst [vmem:[%s3107_s19 + $0x48] sm:$0xff] %v1802_v16  ;;  %v1756_v25 = vpop.permute.xlu1 %1755 }
 0x473   : > { %v1801_v51 = vmul.f32 %v1756_v25, %v1622_v28  ;;  %v1771_v34 = vpop.permute.xlu0 %1770 }
 0x474   : > { %v1804_v43 = vmul.f32 %v1771_v34, %v1625_v2 }
 0x475   : > { %1817 = vst [vmem:[%s3107_s19 + $0x40] sm:$0xff] %v1801_v51 }
 0x476   : > { %1820 = vst [vmem:[%s3107_s19 + $0x58] sm:$0xff] %v1804_v43  ;;  %v1766_v21 = vpop.permute.xlu1 %1765 }
 0x477   : > { %v1803_v5 = vmul.f32 %v1766_v21, %v1624_v46  ;;  %v1781_v0 = vpop.permute.xlu0 %1780 }
 0x478   : > { %v1806_v50 = vmul.f32 %v1781_v0, %v1627_v44 }
 0x479   : > { %1819 = vst [vmem:[%s3107_s19 + $0x50] sm:$0xff] %v1803_v5 }
 0x47a   : > { %1822 = vst [vmem:[%s3107_s19 + $0x68] sm:$0xff] %v1806_v50  ;;  %v1776_v19 = vpop.permute.xlu1 %1775 }
 0x47b   : > { %v1805_v55 = vmul.f32 %v1776_v19, %v1626_v56  ;;  %v1791_v63 = vpop.permute.xlu0 %1790 }
 0x47c   : > { %v1808_v3 = vmul.f32 %v1791_v63, %v1629_v58 }
 0x47d   : > { %1821 = vst [vmem:[%s3107_s19 + $0x60] sm:$0xff] %v1805_v55 }
 0x47e   : > { %1824 = vst [vmem:[%s3107_s19 + $0x78] sm:$0xff] %v1808_v3  ;;  %v1786_v29 = vpop.permute.xlu1 %1785 }
 0x47f   : > { %v1807_v1 = vmul.f32 %v1786_v29, %v1628_v38 }
 0x481   : > { %1823 = vst [vmem:[%s3107_s19 + $0x70] sm:$0xff] %v1807_v1 }
 0x482   : > { %2385 = shalt.err (!%p2382_p5)
}
 0x483   : > { %s2386_s6 = scalar_lea.hbm %s3135_s28, 2048  ;;  %s2390_s9 = scalar_lea.hbm %s3190_s3, 4096 }
 0x484   : > { %p2387_p6 = scmp.ne.s32.totalorder %s3135_s28, %s2386_s6  ;;  %p2391_p10 = scmp.lt.s32.totalorder %s3135_s28, %s3190_s3 }
 0x485   : > { %p2392_p11 = scmp.lt.s32.totalorder %s2390_s9, %s2386_s6 }
 0x486   : > { %p2388_p7 = pnand %p2387_p6, %p2516_p4 }
 0x487   : > { %p2393_p12 = por %p2392_p11, %p2391_p10 }
 0x488   : > { %p2389_p9 = pneg %p2388_p7 }
 0x48a   : > { %p2394_p13 = pnand %p2393_p12, %p2389_p9 }
 0x48c   : > { %2397 = shalt.err (!%p2394_p13)
}
 0x48d   : > { %s2454_s18 = smov 128   ;;  %s2455_s19 = smov 8  }
 0x48e   : > { %2213 = dma.vmem_to_hbm [thread:$0]  (%p2516_p4), %s3137_s23, 2048, %s3135_s28, %s3142_s15, %s2454_s18, %s2454_s18, %s2455_s19  }
 0x48f PF: > { %p2219_p0 = scmp.ge.s32.totalorder %s2448_s17, 2  ;;  %s1856_s21 = sand.u32 1, %s2428_s12  }
 0x490   : > { %s1857_s26 = scalar_lea.sflag [#allocation7], %s1856_s21 }
 0x491   : > { %p2216_p1 = pnand %p2219_p0, %p2523_p8 }
 0x493   : > { %p2217_p2 = pneg %p2216_p1 }
 0x495   : > { %2423 = dma.done.wait (%p2217_p2), %s1857_s26, 2048  }
 0x496   : > { %2425 = vsyncadd (%p2217_p2), %s1857_s26, 4294965248  ;;  %s16_s17 = sadd.s32 1, %s2448_s17   ;;  %s3206_s12 = smov %s2432_s13 }
 0x497   : > { %p13_p3 = scmp.ge.s32.totalorder %s16_s17, 4   ;;  %s3207_s13 = smov %s2436_s14 }
 0x498   : > { %s3208_s14 = smov %s2529_s25  ;;  %s3209_s15 = smov %s2444_s16 }
 0x499   : > { %s3210_s16 = smov %s3212_s20  ;;  %15 = sbr.rel (!%p13_p3) target bundleno = 4 (0x4), region = 82 }
 0x49e   :  { %1862 = vsyncpa [#allocation7], 1 }
 0x49f   :  { %1864 = vsyncpa [#allocation7 + $0x1], 1 }

</bundles_post_ra>
